<compile_context>
chip_gen: v5e
topology: v5e:2x2
jax: 0.10.0
libtpu: 0.0.40
codegen_flags: <defaults>
</compile_context>

<pallas_src>
import functools
import math

import jax
import jax.numpy as jnp
from jax import lax
from jax.experimental import pallas as pl
from jax.experimental.pallas import tpu as pltpu

COMPUTE_DTYPE = jnp.bfloat16


def _pick_tile(dim, desired):
    # Use the desired tile only if it exactly divides the dim; otherwise use the full
    # extent (always legal for the (8,128) rule).  TODO(synk): pad instead.
    return desired if dim % desired == 0 else dim


# ----------------------------- Pallas kernels ------------------------------

def _matmul_kernel(x_ref, w_ref, b_ref, o_ref, acc_ref, *, activation):
    """K-tiled matmul: out = act(x @ w + b)."""
    @pl.when(pl.program_id(2) == 0)
    def _():
        acc_ref[...] = jnp.zeros_like(acc_ref)

    acc_ref[...] += jnp.dot(x_ref[...], w_ref[...],
                            preferred_element_type=jnp.float32)

    @pl.when(pl.program_id(2) == pl.num_programs(2) - 1)
    def _():
        acc = acc_ref[...] + b_ref[...].astype(jnp.float32)
        if activation == "gelu":
            acc = jax.nn.gelu(acc)
        o_ref[...] = acc.astype(o_ref.dtype)


def _matmul_res_kernel(x_ref, w_ref, b_ref, res_ref, o_ref, acc_ref):
    """K-tiled matmul with fused residual: out = res + x @ w + b."""
    @pl.when(pl.program_id(2) == 0)
    def _():
        acc_ref[...] = jnp.zeros_like(acc_ref)

    acc_ref[...] += jnp.dot(x_ref[...], w_ref[...],
                            preferred_element_type=jnp.float32)

    @pl.when(pl.program_id(2) == pl.num_programs(2) - 1)
    def _():
        acc = acc_ref[...] + b_ref[...].astype(jnp.float32) \
            + res_ref[...].astype(jnp.float32)
        o_ref[...] = acc.astype(o_ref.dtype)


def _ln_matmul_kernel(x_ref, g_ref, b_ref, w_ref, bias_ref, o_ref, *, eps, activation):
    """Fused LayerNorm + projection: out = act(LN(x) @ w + bias).  Full K per block."""
    x = x_ref[...].astype(jnp.float32)                       # (tm, K)
    mean = jnp.mean(x, axis=-1, keepdims=True)
    var = jnp.mean(jnp.square(x - mean), axis=-1, keepdims=True)
    h = (x - mean) * lax.rsqrt(var + eps)
    h = h * g_ref[...].astype(jnp.float32) + b_ref[...].astype(jnp.float32)
    acc = jnp.dot(h.astype(w_ref.dtype), w_ref[...],
                  preferred_element_type=jnp.float32)
    acc = acc + bias_ref[...].astype(jnp.float32)
    if activation == "gelu":
        acc = jax.nn.gelu(acc)
    o_ref[...] = acc.astype(o_ref.dtype)


def _flash_attn_kernel(q_ref, k_ref, v_ref, o_ref, m_ref, l_ref, acc_ref,
                       *, scale, causal, tq, tkv):
    """Online-softmax attention over KV tiles. Refs are (hb, tq, Dh)/(hb, tkv, Dh)."""
    kv_i = pl.program_id(2)

    @pl.when(kv_i == 0)
    def _():
        m_ref[...] = jnp.full_like(m_ref, -jnp.inf)
        l_ref[...] = jnp.zeros_like(l_ref)
        acc_ref[...] = jnp.zeros_like(acc_ref)

    # Fold 1/sqrt(Dh) into q (cheaper than scaling the (tq, tkv) scores).
    q = (q_ref[...].astype(jnp.float32) * scale).astype(q_ref.dtype)
    s = jnp.einsum("hqd,hkd->hqk", q, k_ref[...],
                   preferred_element_type=jnp.float32)        # (hb, tq, tkv)

    if causal:
        q_i = pl.program_id(1)
        row = lax.broadcasted_iota(jnp.int32, s.shape, 1) + q_i * tq
        col = lax.broadcasted_iota(jnp.int32, s.shape, 2) + kv_i * tkv
        s = jnp.where(col <= row, s, jnp.float32(-1e30))

    m_prev = m_ref[...]
    m_new = jnp.maximum(m_prev, jnp.max(s, axis=-1, keepdims=True))
    alpha = jnp.exp(m_prev - m_new)
    p = jnp.exp(s - m_new)
    l_ref[...] = alpha * l_ref[...] + jnp.sum(p, axis=-1, keepdims=True)
    acc_ref[...] = alpha * acc_ref[...] + jnp.einsum(
        "hqk,hkd->hqd", p.astype(v_ref.dtype), v_ref[...],
        preferred_element_type=jnp.float32)
    m_ref[...] = m_new

    @pl.when(kv_i == pl.num_programs(2) - 1)
    def _():
        inv_l = pl.reciprocal(l_ref[...], approx=True)
        o_ref[...] = (acc_ref[...] * inv_l).astype(o_ref.dtype)


# ----------------------------- kernel wrappers ------------------------------

def linear(x2d, w, b=None, activation=None, residual=None,
           tm=256, tn=256, tk=512):
    """x2d: (M, K) bf16, w: (K, N) bf16, b: (N,) f32 or None, residual: (M, N) or None."""
    M, K = x2d.shape
    N = w.shape[1]
    tm, tn, tk = _pick_tile(M, tm), _pick_tile(N, tn), _pick_tile(K, tk)
    if b is None:
        b = jnp.zeros((N,), jnp.float32)
    b2 = b.reshape(1, N).astype(jnp.float32)

    in_specs = [
        pl.BlockSpec((tm, tk), lambda i, j, k: (i, k)),
        pl.BlockSpec((tk, tn), lambda i, j, k: (k, j)),
        pl.BlockSpec((1, tn), lambda i, j, k: (0, j)),
    ]
    args = [x2d, w, b2]
    if residual is not None:
        in_specs.append(pl.BlockSpec((tm, tn), lambda i, j, k: (i, j)))
        args.append(residual)
        kernel = _matmul_res_kernel
    else:
        kernel = functools.partial(_matmul_kernel, activation=activation)

    return pl.pallas_call(
        kernel,
        out_shape=jax.ShapeDtypeStruct((M, N), x2d.dtype),
        grid_spec=pltpu.PrefetchScalarGridSpec(
            num_scalar_prefetch=0,
            grid=(M // tm, N // tn, K // tk),
            in_specs=in_specs,
            out_specs=pl.BlockSpec((tm, tn), lambda i, j, k: (i, j)),
            scratch_shapes=[pltpu.VMEM((tm, tn), jnp.float32)],
        ),
        compiler_params=pltpu.CompilerParams(
            dimension_semantics=("parallel", "parallel", "arbitrary")),
    )(*args)


def ln_linear(x2d, gamma, beta, w, bias, activation=None, eps=1e-5,
              out_dtype=None, tm=256, tn=256):
    """Fused LayerNorm(x) @ w + bias.  x2d: (M, K); w: (K, N)."""
    M, K = x2d.shape
    N = w.shape[1]
    tm, tn = _pick_tile(M, tm), _pick_tile(N, tn)
    out_dtype = out_dtype or x2d.dtype
    return pl.pallas_call(
        functools.partial(_ln_matmul_kernel, eps=eps, activation=activation),
        out_shape=jax.ShapeDtypeStruct((M, N), out_dtype),
        grid_spec=pltpu.PrefetchScalarGridSpec(
            num_scalar_prefetch=0,
            grid=(M // tm, N // tn),
            in_specs=[
                pl.BlockSpec((tm, K), lambda i, j: (i, 0)),
                pl.BlockSpec((1, K), lambda i, j: (0, 0)),
                pl.BlockSpec((1, K), lambda i, j: (0, 0)),
                pl.BlockSpec((K, tn), lambda i, j: (0, j)),
                pl.BlockSpec((1, tn), lambda i, j: (0, j)),
            ],
            out_specs=pl.BlockSpec((tm, tn), lambda i, j: (i, j)),
        ),
        compiler_params=pltpu.CompilerParams(
            dimension_semantics=("parallel", "parallel")),
    )(x2d, gamma.reshape(1, K).astype(jnp.float32),
      beta.reshape(1, K).astype(jnp.float32),
      w, bias.reshape(1, N).astype(jnp.float32))


def attention(q, k, v, causal, hb=4, tq=256, tkv=256):
    """q: (BH, T, Dh), k/v: (BH, S, Dh) -> (BH, T, Dh). Flash-style over KV tiles."""
    BH, T, Dh = q.shape
    S = k.shape[1]
    hb, tq, tkv = _pick_tile(BH, hb), _pick_tile(T, tq), _pick_tile(S, tkv)
    scale = 1.0 / math.sqrt(Dh)
    return pl.pallas_call(
        functools.partial(_flash_attn_kernel, scale=scale, causal=causal,
                          tq=tq, tkv=tkv),
        out_shape=jax.ShapeDtypeStruct((BH, T, Dh), q.dtype),
        grid_spec=pltpu.PrefetchScalarGridSpec(
            num_scalar_prefetch=0,
            grid=(BH // hb, T // tq, S // tkv),
            in_specs=[
                pl.BlockSpec((hb, tq, Dh), lambda b, qi, ki: (b, qi, 0)),
                pl.BlockSpec((hb, tkv, Dh), lambda b, qi, ki: (b, ki, 0)),
                pl.BlockSpec((hb, tkv, Dh), lambda b, qi, ki: (b, ki, 0)),
            ],
            out_specs=pl.BlockSpec((hb, tq, Dh), lambda b, qi, ki: (b, qi, 0)),
            scratch_shapes=[
                pltpu.VMEM((hb, tq, 1), jnp.float32),   # running max
                pltpu.VMEM((hb, tq, 1), jnp.float32),   # running denom
                pltpu.VMEM((hb, tq, Dh), jnp.float32),  # output accumulator
            ],
        ),
        compiler_params=pltpu.CompilerParams(
            dimension_semantics=("parallel", "parallel", "arbitrary")),
    )(q, k, v)


# ----------------------------- model composition ----------------------------

def _split_heads(a2d, B, L, H, Dh):
    return a2d.reshape(B, L, H, Dh).transpose(0, 2, 1, 3).reshape(B * H, L, Dh)


def _merge_heads(a3d, B, L, H, Dh):
    return a3d.reshape(B, H, L, Dh).transpose(0, 2, 1, 3).reshape(B * L, H * Dh)


def self_attn_sublayer(x, p, n_heads):
    B, T, D = x.shape
    Dh = D // n_heads
    x2 = x.reshape(B * T, D)
    # Fused LN + QKV projection (one (D, 3D) matmul).
    qkv = ln_linear(x2, p["ln1_g"], p["ln1_b"], p["self_wqkv"], p["self_bqkv"])
    q, k, v = jnp.split(qkv, 3, axis=-1)
    q = _split_heads(q, B, T, n_heads, Dh)
    k = _split_heads(k, B, T, n_heads, Dh)
    v = _split_heads(v, B, T, n_heads, Dh)
    o = attention(q, k, v, causal=True)
    o = _merge_heads(o, B, T, n_heads, Dh)
    # Output projection with residual add fused into the matmul.
    out = linear(o, p["self_wo"], p["self_bo"], residual=x2)
    return out.reshape(B, T, D)


def cross_attn_sublayer(x, context, p, n_heads):
    B, T, D = x.shape
    S = context.shape[1]
    Dh = D // n_heads
    x2 = x.reshape(B * T, D)
    c2 = context.reshape(B * S, D)
    q = ln_linear(x2, p["lnx_g"], p["lnx_b"], p["cross_wq"], p["cross_bq"])
    kv = linear(c2, p["cross_wkv"], p["cross_bkv"])          # fused (D, 2D) KV proj
    k, v = jnp.split(kv, 2, axis=-1)
    q = _split_heads(q, B, T, n_heads, Dh)
    k = _split_heads(k, B, S, n_heads, Dh)
    v = _split_heads(v, B, S, n_heads, Dh)
    o = attention(q, k, v, causal=False)
    o = _merge_heads(o, B, T, n_heads, Dh)
    out = linear(o, p["cross_wo"], p["cross_bo"], residual=x2)
    return out.reshape(B, T, D)


def mlp_sublayer(x, p):
    B, T, D = x.shape
    x2 = x.reshape(B * T, D)
    h = ln_linear(x2, p["ln2_g"], p["ln2_b"], p["mlp_w1"], p["mlp_b1"],
                  activation="gelu")
    out = linear(h, p["mlp_w2"], p["mlp_b2"], residual=x2)
    return out.reshape(B, T, D)


def text_decoder_forward(params, tokens, image_feats, n_heads):
    B, T = tokens.shape
    x = jnp.take(params["token_emb"], tokens, axis=0)         # (B, T, D) gather
    x = x + params["pos_emb"][:, :T]
    ctx = image_feats.astype(x.dtype)
    for blk in params["blocks"]:
        x = self_attn_sublayer(x, blk, n_heads)
        x = cross_attn_sublayer(x, ctx, blk, n_heads)
        x = mlp_sublayer(x, blk)
    B, T, D = x.shape
    vocab = params["lm_head_w"].shape[1]
    # Final LayerNorm fused into the lm_head matmul (no bias).
    logits = ln_linear(x.reshape(B * T, D), params["norm_g"], params["norm_b"],
                       params["lm_head_w"], jnp.zeros((vocab,), jnp.float32),
                       out_dtype=jnp.float32)
    return logits.reshape(B, T, vocab)


# ----------------------------- parameter init -------------------------------

def init_params(key, vocab, dim, max_len, depth, mlp_ratio=4):
    keys = iter(jax.random.split(key, 256))

    def dense(k_in, k_out):
        w = (jax.random.normal(next(keys), (k_in, k_out), jnp.float32) * 0.02)
        return w.astype(COMPUTE_DTYPE), jnp.zeros((k_out,), jnp.float32)

    blocks = []
    for _ in range(depth):
        wqkv, bqkv = dense(dim, 3 * dim)
        swo, sbo = dense(dim, dim)
        cwq, cbq = dense(dim, dim)
        cwkv, cbkv = dense(dim, 2 * dim)
        cwo, cbo = dense(dim, dim)
        w1, b1 = dense(dim, mlp_ratio * dim)
        w2, b2 = dense(mlp_ratio * dim, dim)
        blocks.append(dict(
            ln1_g=jnp.ones((dim,), jnp.float32), ln1_b=jnp.zeros((dim,), jnp.float32),
            lnx_g=jnp.ones((dim,), jnp.float32), lnx_b=jnp.zeros((dim,), jnp.float32),
            ln2_g=jnp.ones((dim,), jnp.float32), ln2_b=jnp.zeros((dim,), jnp.float32),
            self_wqkv=wqkv, self_bqkv=bqkv, self_wo=swo, self_bo=sbo,
            cross_wq=cwq, cross_bq=cbq, cross_wkv=cwkv, cross_bkv=cbkv,
            cross_wo=cwo, cross_bo=cbo,
            mlp_w1=w1, mlp_b1=b1, mlp_w2=w2, mlp_b2=b2,
        ))

    return dict(
        token_emb=(jax.random.normal(next(keys), (vocab, dim), jnp.float32)
                   * 0.02).astype(COMPUTE_DTYPE),
        pos_emb=(jax.random.normal(next(keys), (1, max_len, dim), jnp.float32)
                 * 0.02).astype(COMPUTE_DTYPE),
        blocks=blocks,
        norm_g=jnp.ones((dim,), jnp.float32), norm_b=jnp.zeros((dim,), jnp.float32),
        lm_head_w=(jax.random.normal(next(keys), (dim, vocab), jnp.float32)
                   * 0.02).astype(COMPUTE_DTYPE),
    )


# ----------------------------------- main ------------------------------------

if __name__ == "__main__":
    vocab_size = 64
    dim = 32
    max_text_length = 16
    depth = 2
    n_heads = 4
    B, T, N_img = 2, 8, 16

    key = jax.random.PRNGKey(0)
    k_param, k_tok, k_img = jax.random.split(key, 3)

    params = init_params(k_param, vocab_size, dim, max_text_length, depth)
    tokens = jax.random.randint(k_tok, (B, T), 0, vocab_size, dtype=jnp.int32)
    image_feats = jax.random.normal(k_img, (B, N_img, dim), jnp.float32)

    fwd = jax.jit(functools.partial(text_decoder_forward, n_heads=n_heads))
    logits = fwd(params, tokens, image_feats)
    logits = jax.block_until_ready(logits)
    assert logits.shape == (B, T, vocab_size), logits.shape
    assert bool(jnp.all(jnp.isfinite(logits)))
    print("KERNEL_OK")
</pallas_src>

<mosaic_0001>
module attributes {stable_mosaic.version = 11 : i64} {
  func.func @_ln_matmul_kernel(%arg0: i32, %arg1: i32, %arg2: memref<16x32xbf16, #tpu.memory_space<vmem>>, %arg3: memref<1x32xf32, #tpu.memory_space<vmem>>, %arg4: memref<1x32xf32, #tpu.memory_space<vmem>>, %arg5: memref<32x32xbf16, #tpu.memory_space<vmem>>, %arg6: memref<1x32xf32, #tpu.memory_space<vmem>>, %arg7: memref<16x32xbf16, #tpu.memory_space<vmem>>) attributes {dimension_semantics = [#tpu.dimension_semantics<parallel>, #tpu.dimension_semantics<parallel>], iteration_bounds = array<i64: 1, 1>, scalar_prefetch = 0 : i64, scratch_operands = 0 : i64, tpu.core_type = #tpu.core_type<tc>, window_params = [{transform_indices = @transform_0, window_bounds = array<i64: 16, 32>}, {pipeline_mode = #tpu.pipeline_mode<synchronous>, transform_indices = @transform_1, window_bounds = array<i64: 1, 32>}, {pipeline_mode = #tpu.pipeline_mode<synchronous>, transform_indices = @transform_2, window_bounds = array<i64: 1, 32>}, {transform_indices = @transform_3, window_bounds = array<i64: 32, 32>}, {transform_indices = @transform_4, window_bounds = array<i64: 1, 32>}, {transform_indices = @transform_5, window_bounds = array<i64: 16, 32>}]} {
    %c0 = arith.constant 0 : index
    %c0_0 = arith.constant 0 : index
    %0 = vector.load %arg2[%c0, %c0_0] : memref<16x32xbf16, #tpu.memory_space<vmem>>, vector<16x32xbf16>
    %1 = arith.extf %0 : vector<16x32xbf16> to vector<16x32xf32>
    %cst = arith.constant dense<0.000000e+00> : vector<16xf32>
    %2 = vector.multi_reduction <add>, %1, %cst [1] : vector<16x32xf32> to vector<16xf32>
    %3 = vector.shape_cast %2 : vector<16xf32> to vector<16x1xf32>
    %cst_1 = arith.constant 3.200000e+01 : f32
    %4 = vector.broadcast %cst_1 : f32 to vector<16x1xf32>
    %5 = arith.divf %3, %4 : vector<16x1xf32>
    %6 = vector.broadcast %5 : vector<16x1xf32> to vector<16x32xf32>
    %7 = arith.subf %1, %6 : vector<16x32xf32>
    %8 = arith.mulf %7, %7 : vector<16x32xf32>
    %cst_2 = arith.constant dense<0.000000e+00> : vector<16xf32>
    %9 = vector.multi_reduction <add>, %8, %cst_2 [1] : vector<16x32xf32> to vector<16xf32>
    %10 = vector.shape_cast %9 : vector<16xf32> to vector<16x1xf32>
    %cst_3 = arith.constant 3.200000e+01 : f32
    %11 = vector.broadcast %cst_3 : f32 to vector<16x1xf32>
    %12 = arith.divf %10, %11 : vector<16x1xf32>
    %13 = vector.broadcast %5 : vector<16x1xf32> to vector<16x32xf32>
    %14 = arith.subf %1, %13 : vector<16x32xf32>
    %cst_4 = arith.constant 9.99999974E-6 : f32
    %15 = vector.broadcast %cst_4 : f32 to vector<16x1xf32>
    %16 = arith.addf %12, %15 : vector<16x1xf32>
    %17 = math.rsqrt %16 : vector<16x1xf32>
    %18 = vector.broadcast %17 : vector<16x1xf32> to vector<16x32xf32>
    %19 = arith.mulf %14, %18 : vector<16x32xf32>
    %c0_5 = arith.constant 0 : index
    %c0_6 = arith.constant 0 : index
    %20 = vector.load %arg3[%c0_5, %c0_6] : memref<1x32xf32, #tpu.memory_space<vmem>>, vector<1x32xf32>
    %21 = vector.broadcast %20 : vector<1x32xf32> to vector<16x32xf32>
    %22 = arith.mulf %19, %21 : vector<16x32xf32>
    %c0_7 = arith.constant 0 : index
    %c0_8 = arith.constant 0 : index
    %23 = vector.load %arg4[%c0_7, %c0_8] : memref<1x32xf32, #tpu.memory_space<vmem>>, vector<1x32xf32>
    %24 = vector.broadcast %23 : vector<1x32xf32> to vector<16x32xf32>
    %25 = arith.addf %22, %24 : vector<16x32xf32>
    %26 = arith.truncf %25 : vector<16x32xf32> to vector<16x32xbf16>
    %c0_9 = arith.constant 0 : index
    %c0_10 = arith.constant 0 : index
    %27 = vector.load %arg5[%c0_9, %c0_10] : memref<32x32xbf16, #tpu.memory_space<vmem>>, vector<32x32xbf16>
    %cst_11 = arith.constant dense<0.000000e+00> : vector<16x32xf32>
    %28 = tpu.matmul %26, %27, %cst_11 {dimension_numbers = #tpu.dot_dimension_numbers<[1], [0], [0], [1], [0, 0, 1, 1], [], []>} : vector<16x32xbf16>, vector<32x32xbf16>, vector<16x32xf32> -> vector<16x32xf32>
    %c0_12 = arith.constant 0 : index
    %c0_13 = arith.constant 0 : index
    %29 = vector.load %arg6[%c0_12, %c0_13] : memref<1x32xf32, #tpu.memory_space<vmem>>, vector<1x32xf32>
    %30 = vector.broadcast %29 : vector<1x32xf32> to vector<16x32xf32>
    %31 = arith.addf %28, %30 : vector<16x32xf32>
    %32 = arith.truncf %31 : vector<16x32xf32> to vector<16x32xbf16>
    %c0_14 = arith.constant 0 : index
    %c0_15 = arith.constant 0 : index
    %33 = vector.load %arg7[%c0_14, %c0_15] : memref<16x32xbf16, #tpu.memory_space<vmem>>, vector<16x32xbf16>
    tpu.vector_store %arg7[%c0_14, %c0_15], %32 {strides = array<i32>} : memref<16x32xbf16, #tpu.memory_space<vmem>>, vector<16x32xbf16>,
    return
  }
  func.func @transform_0(%arg0: i32, %arg1: i32) -> (i32, i32) {
    %c0_i32 = arith.constant 0 : i32
    %c0_i32_0 = arith.constant 0 : i32
    return %arg0, %c0_i32 : i32, i32
  }
  func.func @transform_1(%arg0: i32, %arg1: i32) -> (i32, i32) {
    %c0_i32 = arith.constant 0 : i32
    %c0_i32_0 = arith.constant 0 : i32
    %c0_i32_1 = arith.constant 0 : i32
    return %c0_i32, %c0_i32_0 : i32, i32
  }
  func.func @transform_2(%arg0: i32, %arg1: i32) -> (i32, i32) {
    %c0_i32 = arith.constant 0 : i32
    %c0_i32_0 = arith.constant 0 : i32
    %c0_i32_1 = arith.constant 0 : i32
    return %c0_i32, %c0_i32_0 : i32, i32
  }
  func.func @transform_3(%arg0: i32, %arg1: i32) -> (i32, i32) {
    %c0_i32 = arith.constant 0 : i32
    %c0_i32_0 = arith.constant 0 : i32
    return %c0_i32, %arg1 : i32, i32
  }
  func.func @transform_4(%arg0: i32, %arg1: i32) -> (i32, i32) {
    %c0_i32 = arith.constant 0 : i32
    %c0_i32_0 = arith.constant 0 : i32
    return %c0_i32, %arg1 : i32, i32
  }
  func.func @transform_5(%arg0: i32, %arg1: i32) -> (i32, i32) {
    %c0_i32 = arith.constant 0 : i32
    return %arg0, %arg1 : i32, i32
  }
}

module attributes {stable_mosaic.version = 11 : i64} {
  func.func @_matmul_res_kernel(%arg0: i32, %arg1: i32, %arg2: i32, %arg3: memref<16x32xbf16, #tpu.memory_space<vmem>>, %arg4: memref<32x32xbf16, #tpu.memory_space<vmem>>, %arg5: memref<1x32xf32, #tpu.memory_space<vmem>>, %arg6: memref<16x32xbf16, #tpu.memory_space<vmem>>, %arg7: memref<16x32xbf16, #tpu.memory_space<vmem>>, %arg8: memref<16x32xf32, #tpu.memory_space<vmem>>) attributes {dimension_semantics = [#tpu.dimension_semantics<parallel>, #tpu.dimension_semantics<parallel>, #tpu.dimension_semantics<arbitrary>], iteration_bounds = array<i64: 1, 1, 1>, scalar_prefetch = 0 : i64, scratch_operands = 1 : i64, tpu.core_type = #tpu.core_type<tc>, window_params = [{transform_indices = @transform_0, window_bounds = array<i64: 16, 32>}, {transform_indices = @transform_1, window_bounds = array<i64: 32, 32>}, {transform_indices = @transform_2, window_bounds = array<i64: 1, 32>}, {transform_indices = @transform_3, window_bounds = array<i64: 16, 32>}, {transform_indices = @transform_4, window_bounds = array<i64: 16, 32>}]} {
    %c0_i32 = arith.constant 0 : i32
    %0 = arith.cmpi eq, %arg2, %c0_i32 : i32
    %1 = arith.extui %0 : i1 to i32
    %c0_i32_0 = arith.constant 0 : i32
    %2 = arith.cmpi ne, %1, %c0_i32_0 : i32
    scf.if %2 {
      %cst_10 = arith.constant 0.000000e+00 : f32
      %12 = vector.broadcast %cst_10 : f32 to vector<16x32xf32>
      %c0_11 = arith.constant 0 : index
      %c0_12 = arith.constant 0 : index
      %13 = vector.load %arg8[%c0_11, %c0_12] : memref<16x32xf32, #tpu.memory_space<vmem>>, vector<16x32xf32>
      tpu.vector_store %arg8[%c0_11, %c0_12], %12 {strides = array<i32>} : memref<16x32xf32, #tpu.memory_space<vmem>>, vector<16x32xf32>,
    } else {
    }
    %c0 = arith.constant 0 : index
    %c0_1 = arith.constant 0 : index
    %3 = vector.load %arg8[%c0, %c0_1] : memref<16x32xf32, #tpu.memory_space<vmem>>, vector<16x32xf32>
    %c0_2 = arith.constant 0 : index
    %c0_3 = arith.constant 0 : index
    %4 = vector.load %arg3[%c0_2, %c0_3] : memref<16x32xbf16, #tpu.memory_space<vmem>>, vector<16x32xbf16>
    %c0_4 = arith.constant 0 : index
    %c0_5 = arith.constant 0 : index
    %5 = vector.load %arg4[%c0_4, %c0_5] : memref<32x32xbf16, #tpu.memory_space<vmem>>, vector<32x32xbf16>
    %cst = arith.constant dense<0.000000e+00> : vector<16x32xf32>
    %6 = tpu.matmul %4, %5, %cst {dimension_numbers = #tpu.dot_dimension_numbers<[1], [0], [0], [1], [0, 0, 1, 1], [], []>} : vector<16x32xbf16>, vector<32x32xbf16>, vector<16x32xf32> -> vector<16x32xf32>
    %7 = arith.addf %3, %6 : vector<16x32xf32>
    %c0_6 = arith.constant 0 : index
    %c0_7 = arith.constant 0 : index
    %8 = vector.load %arg8[%c0_6, %c0_7] : memref<16x32xf32, #tpu.memory_space<vmem>>, vector<16x32xf32>
    tpu.vector_store %arg8[%c0_6, %c0_7], %7 {strides = array<i32>} : memref<16x32xf32, #tpu.memory_space<vmem>>, vector<16x32xf32>,
    %c0_i32_8 = arith.constant 0 : i32
    %9 = arith.cmpi eq, %arg2, %c0_i32_8 : i32
    %10 = arith.extui %9 : i1 to i32
    %c0_i32_9 = arith.constant 0 : i32
    %11 = arith.cmpi ne, %10, %c0_i32_9 : i32
    scf.if %11 {
      %c0_10 = arith.constant 0 : index
      %c0_11 = arith.constant 0 : index
      %12 = vector.load %arg8[%c0_10, %c0_11] : memref<16x32xf32, #tpu.memory_space<vmem>>, vector<16x32xf32>
      %c0_12 = arith.constant 0 : index
      %c0_13 = arith.constant 0 : index
      %13 = vector.load %arg5[%c0_12, %c0_13] : memref<1x32xf32, #tpu.memory_space<vmem>>, vector<1x32xf32>
      %14 = vector.broadcast %13 : vector<1x32xf32> to vector<16x32xf32>
      %15 = arith.addf %12, %14 : vector<16x32xf32>
      %c0_14 = arith.constant 0 : index
      %c0_15 = arith.constant 0 : index
      %16 = vector.load %arg6[%c0_14, %c0_15] : memref<16x32xbf16, #tpu.memory_space<vmem>>, vector<16x32xbf16>
      %17 = arith.extf %16 : vector<16x32xbf16> to vector<16x32xf32>
      %18 = arith.addf %15, %17 : vector<16x32xf32>
      %19 = arith.truncf %18 : vector<16x32xf32> to vector<16x32xbf16>
      %c0_16 = arith.constant 0 : index
      %c0_17 = arith.constant 0 : index
      %20 = vector.load %arg7[%c0_16, %c0_17] : memref<16x32xbf16, #tpu.memory_space<vmem>>, vector<16x32xbf16>
      tpu.vector_store %arg7[%c0_16, %c0_17], %19 {strides = array<i32>} : memref<16x32xbf16, #tpu.memory_space<vmem>>, vector<16x32xbf16>,
    } else {
    }
    return
  }
  func.func @transform_0(%arg0: i32, %arg1: i32, %arg2: i32) -> (i32, i32) {
    %c0_i32 = arith.constant 0 : i32
    return %arg0, %arg2 : i32, i32
  }
  func.func @transform_1(%arg0: i32, %arg1: i32, %arg2: i32) -> (i32, i32) {
    %c0_i32 = arith.constant 0 : i32
    return %arg2, %arg1 : i32, i32
  }
  func.func @transform_2(%arg0: i32, %arg1: i32, %arg2: i32) -> (i32, i32) {
    %c0_i32 = arith.constant 0 : i32
    %c0_i32_0 = arith.constant 0 : i32
    return %c0_i32, %arg1 : i32, i32
  }
  func.func @transform_3(%arg0: i32, %arg1: i32, %arg2: i32) -> (i32, i32) {
    %c0_i32 = arith.constant 0 : i32
    return %arg0, %arg1 : i32, i32
  }
  func.func @transform_4(%arg0: i32, %arg1: i32, %arg2: i32) -> (i32, i32) {
    %c0_i32 = arith.constant 0 : i32
    return %arg0, %arg1 : i32, i32
  }
}

module attributes {stable_mosaic.version = 11 : i64} {
  func.func @_ln_matmul_kernel(%arg0: i32, %arg1: i32, %arg2: memref<16x32xbf16, #tpu.memory_space<vmem>>, %arg3: memref<1x32xf32, #tpu.memory_space<vmem>>, %arg4: memref<1x32xf32, #tpu.memory_space<vmem>>, %arg5: memref<32x96xbf16, #tpu.memory_space<vmem>>, %arg6: memref<1x96xf32, #tpu.memory_space<vmem>>, %arg7: memref<16x96xbf16, #tpu.memory_space<vmem>>) attributes {dimension_semantics = [#tpu.dimension_semantics<parallel>, #tpu.dimension_semantics<parallel>], iteration_bounds = array<i64: 1, 1>, scalar_prefetch = 0 : i64, scratch_operands = 0 : i64, tpu.core_type = #tpu.core_type<tc>, window_params = [{transform_indices = @transform_0, window_bounds = array<i64: 16, 32>}, {pipeline_mode = #tpu.pipeline_mode<synchronous>, transform_indices = @transform_1, window_bounds = array<i64: 1, 32>}, {pipeline_mode = #tpu.pipeline_mode<synchronous>, transform_indices = @transform_2, window_bounds = array<i64: 1, 32>}, {transform_indices = @transform_3, window_bounds = array<i64: 32, 96>}, {transform_indices = @transform_4, window_bounds = array<i64: 1, 96>}, {transform_indices = @transform_5, window_bounds = array<i64: 16, 96>}]} {
    %c0 = arith.constant 0 : index
    %c0_0 = arith.constant 0 : index
    %0 = vector.load %arg2[%c0, %c0_0] : memref<16x32xbf16, #tpu.memory_space<vmem>>, vector<16x32xbf16>
    %1 = arith.extf %0 : vector<16x32xbf16> to vector<16x32xf32>
    %cst = arith.constant dense<0.000000e+00> : vector<16xf32>
    %2 = vector.multi_reduction <add>, %1, %cst [1] : vector<16x32xf32> to vector<16xf32>
    %3 = vector.shape_cast %2 : vector<16xf32> to vector<16x1xf32>
    %cst_1 = arith.constant 3.200000e+01 : f32
    %4 = vector.broadcast %cst_1 : f32 to vector<16x1xf32>
    %5 = arith.divf %3, %4 : vector<16x1xf32>
    %6 = vector.broadcast %5 : vector<16x1xf32> to vector<16x32xf32>
    %7 = arith.subf %1, %6 : vector<16x32xf32>
    %8 = arith.mulf %7, %7 : vector<16x32xf32>
    %cst_2 = arith.constant dense<0.000000e+00> : vector<16xf32>
    %9 = vector.multi_reduction <add>, %8, %cst_2 [1] : vector<16x32xf32> to vector<16xf32>
    %10 = vector.shape_cast %9 : vector<16xf32> to vector<16x1xf32>
    %cst_3 = arith.constant 3.200000e+01 : f32
    %11 = vector.broadcast %cst_3 : f32 to vector<16x1xf32>
    %12 = arith.divf %10, %11 : vector<16x1xf32>
    %13 = vector.broadcast %5 : vector<16x1xf32> to vector<16x32xf32>
    %14 = arith.subf %1, %13 : vector<16x32xf32>
    %cst_4 = arith.constant 9.99999974E-6 : f32
    %15 = vector.broadcast %cst_4 : f32 to vector<16x1xf32>
    %16 = arith.addf %12, %15 : vector<16x1xf32>
    %17 = math.rsqrt %16 : vector<16x1xf32>
    %18 = vector.broadcast %17 : vector<16x1xf32> to vector<16x32xf32>
    %19 = arith.mulf %14, %18 : vector<16x32xf32>
    %c0_5 = arith.constant 0 : index
    %c0_6 = arith.constant 0 : index
    %20 = vector.load %arg3[%c0_5, %c0_6] : memref<1x32xf32, #tpu.memory_space<vmem>>, vector<1x32xf32>
    %21 = vector.broadcast %20 : vector<1x32xf32> to vector<16x32xf32>
    %22 = arith.mulf %19, %21 : vector<16x32xf32>
    %c0_7 = arith.constant 0 : index
    %c0_8 = arith.constant 0 : index
    %23 = vector.load %arg4[%c0_7, %c0_8] : memref<1x32xf32, #tpu.memory_space<vmem>>, vector<1x32xf32>
    %24 = vector.broadcast %23 : vector<1x32xf32> to vector<16x32xf32>
    %25 = arith.addf %22, %24 : vector<16x32xf32>
    %26 = arith.truncf %25 : vector<16x32xf32> to vector<16x32xbf16>
    %c0_9 = arith.constant 0 : index
    %c0_10 = arith.constant 0 : index
    %27 = vector.load %arg5[%c0_9, %c0_10] : memref<32x96xbf16, #tpu.memory_space<vmem>>, vector<32x96xbf16>
    %cst_11 = arith.constant dense<0.000000e+00> : vector<16x96xf32>
    %28 = tpu.matmul %26, %27, %cst_11 {dimension_numbers = #tpu.dot_dimension_numbers<[1], [0], [0], [1], [0, 0, 1, 1], [], []>} : vector<16x32xbf16>, vector<32x96xbf16>, vector<16x96xf32> -> vector<16x96xf32>
    %c0_12 = arith.constant 0 : index
    %c0_13 = arith.constant 0 : index
    %29 = vector.load %arg6[%c0_12, %c0_13] : memref<1x96xf32, #tpu.memory_space<vmem>>, vector<1x96xf32>
    %30 = vector.broadcast %29 : vector<1x96xf32> to vector<16x96xf32>
    %31 = arith.addf %28, %30 : vector<16x96xf32>
    %32 = arith.truncf %31 : vector<16x96xf32> to vector<16x96xbf16>
    %c0_14 = arith.constant 0 : index
    %c0_15 = arith.constant 0 : index
    %33 = vector.load %arg7[%c0_14, %c0_15] : memref<16x96xbf16, #tpu.memory_space<vmem>>, vector<16x96xbf16>
    tpu.vector_store %arg7[%c0_14, %c0_15], %32 {strides = array<i32>} : memref<16x96xbf16, #tpu.memory_space<vmem>>, vector<16x96xbf16>,
    return
  }
  func.func @transform_0(%arg0: i32, %arg1: i32) -> (i32, i32) {
    %c0_i32 = arith.constant 0 : i32
    %c0_i32_0 = arith.constant 0 : i32
    return %arg0, %c0_i32 : i32, i32
  }
  func.func @transform_1(%arg0: i32, %arg1: i32) -> (i32, i32) {
    %c0_i32 = arith.constant 0 : i32
    %c0_i32_0 = arith.constant 0 : i32
    %c0_i32_1 = arith.constant 0 : i32
    return %c0_i32, %c0_i32_0 : i32, i32
  }
  func.func @transform_2(%arg0: i32, %arg1: i32) -> (i32, i32) {
    %c0_i32 = arith.constant 0 : i32
    %c0_i32_0 = arith.constant 0 : i32
    %c0_i32_1 = arith.constant 0 : i32
    return %c0_i32, %c0_i32_0 : i32, i32
  }
  func.func @transform_3(%arg0: i32, %arg1: i32) -> (i32, i32) {
    %c0_i32 = arith.constant 0 : i32
    %c0_i32_0 = arith.constant 0 : i32
    return %c0_i32, %arg1 : i32, i32
  }
  func.func @transform_4(%arg0: i32, %arg1: i32) -> (i32, i32) {
    %c0_i32 = arith.constant 0 : i32
    %c0_i32_0 = arith.constant 0 : i32
    return %c0_i32, %arg1 : i32, i32
  }
  func.func @transform_5(%arg0: i32, %arg1: i32) -> (i32, i32) {
    %c0_i32 = arith.constant 0 : i32
    return %arg0, %arg1 : i32, i32
  }
}

module attributes {stable_mosaic.version = 11 : i64} {
  func.func @_flash_attn_kernel(%arg0: i32, %arg1: i32, %arg2: i32, %arg3: memref<4x8x8xbf16, #tpu.memory_space<vmem>>, %arg4: memref<4x8x8xbf16, #tpu.memory_space<vmem>>, %arg5: memref<4x8x8xbf16, #tpu.memory_space<vmem>>, %arg6: memref<4x8x8xbf16, #tpu.memory_space<vmem>>, %arg7: memref<4x8x1xf32, #tpu.memory_space<vmem>>, %arg8: memref<4x8x1xf32, #tpu.memory_space<vmem>>, %arg9: memref<4x8x8xf32, #tpu.memory_space<vmem>>) attributes {dimension_semantics = [#tpu.dimension_semantics<parallel>, #tpu.dimension_semantics<parallel>, #tpu.dimension_semantics<arbitrary>], iteration_bounds = array<i64: 2, 1, 1>, scalar_prefetch = 0 : i64, scratch_operands = 3 : i64, tpu.core_type = #tpu.core_type<tc>, window_params = [{transform_indices = @transform_0, window_bounds = array<i64: 4, 8, 8>}, {transform_indices = @transform_1, window_bounds = array<i64: 4, 8, 8>}, {transform_indices = @transform_2, window_bounds = array<i64: 4, 8, 8>}, {transform_indices = @transform_3, window_bounds = array<i64: 4, 8, 8>}]} {
    %c0_i32 = arith.constant 0 : i32
    %0 = arith.cmpi eq, %arg2, %c0_i32 : i32
    %1 = arith.extui %0 : i1 to i32
    %c0_i32_0 = arith.constant 0 : i32
    %2 = arith.cmpi ne, %1, %c0_i32_0 : i32
    scf.if %2 {
      %cst_35 = arith.constant 0xFF800000 : f32
      %48 = vector.broadcast %cst_35 : f32 to vector<4x8x1xf32>
      %c0_36 = arith.constant 0 : index
      %c0_37 = arith.constant 0 : index
      %c0_38 = arith.constant 0 : index
      %49 = vector.load %arg7[%c0_36, %c0_37, %c0_38] : memref<4x8x1xf32, #tpu.memory_space<vmem>>, vector<4x8x1xf32>
      tpu.vector_store %arg7[%c0_36, %c0_37, %c0_38], %48 {strides = array<i32>} : memref<4x8x1xf32, #tpu.memory_space<vmem>>, vector<4x8x1xf32>,
      %cst_39 = arith.constant 0.000000e+00 : f32
      %50 = vector.broadcast %cst_39 : f32 to vector<4x8x1xf32>
      %c0_40 = arith.constant 0 : index
      %c0_41 = arith.constant 0 : index
      %c0_42 = arith.constant 0 : index
      %51 = vector.load %arg8[%c0_40, %c0_41, %c0_42] : memref<4x8x1xf32, #tpu.memory_space<vmem>>, vector<4x8x1xf32>
      tpu.vector_store %arg8[%c0_40, %c0_41, %c0_42], %50 {strides = array<i32>} : memref<4x8x1xf32, #tpu.memory_space<vmem>>, vector<4x8x1xf32>,
      %cst_43 = arith.constant 0.000000e+00 : f32
      %52 = vector.broadcast %cst_43 : f32 to vector<4x8x8xf32>
      %c0_44 = arith.constant 0 : index
      %c0_45 = arith.constant 0 : index
      %c0_46 = arith.constant 0 : index
      %53 = vector.load %arg9[%c0_44, %c0_45, %c0_46] : memref<4x8x8xf32, #tpu.memory_space<vmem>>, vector<4x8x8xf32>
      tpu.vector_store %arg9[%c0_44, %c0_45, %c0_46], %52 {strides = array<i32>} : memref<4x8x8xf32, #tpu.memory_space<vmem>>, vector<4x8x8xf32>,
    } else {
    }
    %c0 = arith.constant 0 : index
    %c0_1 = arith.constant 0 : index
    %c0_2 = arith.constant 0 : index
    %3 = vector.load %arg3[%c0, %c0_1, %c0_2] : memref<4x8x8xbf16, #tpu.memory_space<vmem>>, vector<4x8x8xbf16>
    %4 = arith.extf %3 : vector<4x8x8xbf16> to vector<4x8x8xf32>
    %cst = arith.constant 0.353553385 : f32
    %5 = vector.broadcast %cst : f32 to vector<4x8x8xf32>
    %6 = arith.mulf %4, %5 : vector<4x8x8xf32>
    %7 = arith.truncf %6 : vector<4x8x8xf32> to vector<4x8x8xbf16>
    %c0_3 = arith.constant 0 : index
    %c0_4 = arith.constant 0 : index
    %c0_5 = arith.constant 0 : index
    %8 = vector.load %arg4[%c0_3, %c0_4, %c0_5] : memref<4x8x8xbf16, #tpu.memory_space<vmem>>, vector<4x8x8xbf16>
    "tpu.trace_start"() <{level = 10 : i32, message = "hqd,hkd->hqk"}> : () -> ()
    %cst_6 = arith.constant dense<0.000000e+00> : vector<4x8x8xf32>
    %9 = tpu.matmul %7, %8, %cst_6 {dimension_numbers = #tpu.dot_dimension_numbers<[2], [2], [1], [1], [0, 0, 0, 1, 1, 1], [0], [0]>} : vector<4x8x8xbf16>, vector<4x8x8xbf16>, vector<4x8x8xf32> -> vector<4x8x8xf32>
    "tpu.trace_stop"() : () -> ()
    %10 = tpu.iota {dimensions = array<i32: 1>} : vector<4x8x8xi32>
    %c8_i32 = arith.constant 8 : i32
    %11 = arith.muli %arg1, %c8_i32 : i32
    %12 = vector.broadcast %11 : i32 to vector<4x8x8xi32>
    %13 = arith.addi %10, %12 : vector<4x8x8xi32>
    %14 = tpu.iota {dimensions = array<i32: 2>} : vector<4x8x8xi32>
    %c8_i32_7 = arith.constant 8 : i32
    %15 = arith.muli %arg2, %c8_i32_7 : i32
    %16 = vector.broadcast %15 : i32 to vector<4x8x8xi32>
    %17 = arith.addi %14, %16 : vector<4x8x8xi32>
    %18 = arith.cmpi sle, %17, %13 : vector<4x8x8xi32>
    %cst_8 = arith.constant -1.000000e+30 : f32
    %19 = vector.broadcast %cst_8 : f32 to vector<4x8x8xf32>
    %20 = arith.select %18, %9, %19 : vector<4x8x8xi1>, vector<4x8x8xf32>
    %c0_9 = arith.constant 0 : index
    %c0_10 = arith.constant 0 : index
    %c0_11 = arith.constant 0 : index
    %21 = vector.load %arg7[%c0_9, %c0_10, %c0_11] : memref<4x8x1xf32, #tpu.memory_space<vmem>>, vector<4x8x1xf32>
    %cst_12 = arith.constant dense<0xFF800000> : vector<4x8xf32>
    %22 = vector.multi_reduction <maximumf>, %20, %cst_12 [2] : vector<4x8x8xf32> to vector<4x8xf32>
    %23 = vector.shape_cast %22 : vector<4x8xf32> to vector<4x8x1xf32>
    %24 = arith.maximumf %21, %23 : vector<4x8x1xf32>
    %25 = arith.subf %21, %24 : vector<4x8x1xf32>
    %26 = math.exp %25 : vector<4x8x1xf32>
    %27 = vector.broadcast %24 : vector<4x8x1xf32> to vector<4x8x8xf32>
    %28 = arith.subf %20, %27 : vector<4x8x8xf32>
    %29 = math.exp %28 : vector<4x8x8xf32>
    %c0_13 = arith.constant 0 : index
    %c0_14 = arith.constant 0 : index
    %c0_15 = arith.constant 0 : index
    %30 = vector.load %arg8[%c0_13, %c0_14, %c0_15] : memref<4x8x1xf32, #tpu.memory_space<vmem>>, vector<4x8x1xf32>
    %31 = arith.mulf %26, %30 : vector<4x8x1xf32>
    %cst_16 = arith.constant dense<0.000000e+00> : vector<4x8xf32>
    %32 = vector.multi_reduction <add>, %29, %cst_16 [2] : vector<4x8x8xf32> to vector<4x8xf32>
    %33 = vector.shape_cast %32 : vector<4x8xf32> to vector<4x8x1xf32>
    %34 = arith.addf %31, %33 : vector<4x8x1xf32>
    %c0_17 = arith.constant 0 : index
    %c0_18 = arith.constant 0 : index
    %c0_19 = arith.constant 0 : index
    %35 = vector.load %arg8[%c0_17, %c0_18, %c0_19] : memref<4x8x1xf32, #tpu.memory_space<vmem>>, vector<4x8x1xf32>
    tpu.vector_store %arg8[%c0_17, %c0_18, %c0_19], %34 {strides = array<i32>} : memref<4x8x1xf32, #tpu.memory_space<vmem>>, vector<4x8x1xf32>,
    %c0_20 = arith.constant 0 : index
    %c0_21 = arith.constant 0 : index
    %c0_22 = arith.constant 0 : index
    %36 = vector.load %arg9[%c0_20, %c0_21, %c0_22] : memref<4x8x8xf32, #tpu.memory_space<vmem>>, vector<4x8x8xf32>
    %37 = vector.broadcast %26 : vector<4x8x1xf32> to vector<4x8x8xf32>
    %38 = arith.mulf %37, %36 : vector<4x8x8xf32>
    %39 = arith.truncf %29 : vector<4x8x8xf32> to vector<4x8x8xbf16>
    %c0_23 = arith.constant 0 : index
    %c0_24 = arith.constant 0 : index
    %c0_25 = arith.constant 0 : index
    %40 = vector.load %arg5[%c0_23, %c0_24, %c0_25] : memref<4x8x8xbf16, #tpu.memory_space<vmem>>, vector<4x8x8xbf16>
    "tpu.trace_start"() <{level = 10 : i32, message = "hqk,hkd->hqd"}> : () -> ()
    %cst_26 = arith.constant dense<0.000000e+00> : vector<4x8x8xf32>
    %41 = tpu.matmul %39, %40, %cst_26 {dimension_numbers = #tpu.dot_dimension_numbers<[2], [1], [1], [2], [0, 0, 0, 1, 1, 2], [0], [0]>} : vector<4x8x8xbf16>, vector<4x8x8xbf16>, vector<4x8x8xf32> -> vector<4x8x8xf32>
    "tpu.trace_stop"() : () -> ()
    %42 = arith.addf %38, %41 : vector<4x8x8xf32>
    %c0_27 = arith.constant 0 : index
    %c0_28 = arith.constant 0 : index
    %c0_29 = arith.constant 0 : index
    %43 = vector.load %arg9[%c0_27, %c0_28, %c0_29] : memref<4x8x8xf32, #tpu.memory_space<vmem>>, vector<4x8x8xf32>
    tpu.vector_store %arg9[%c0_27, %c0_28, %c0_29], %42 {strides = array<i32>} : memref<4x8x8xf32, #tpu.memory_space<vmem>>, vector<4x8x8xf32>,
    %c0_30 = arith.constant 0 : index
    %c0_31 = arith.constant 0 : index
    %c0_32 = arith.constant 0 : index
    %44 = vector.load %arg7[%c0_30, %c0_31, %c0_32] : memref<4x8x1xf32, #tpu.memory_space<vmem>>, vector<4x8x1xf32>
    tpu.vector_store %arg7[%c0_30, %c0_31, %c0_32], %24 {strides = array<i32>} : memref<4x8x1xf32, #tpu.memory_space<vmem>>, vector<4x8x1xf32>,
    %c0_i32_33 = arith.constant 0 : i32
    %45 = arith.cmpi eq, %arg2, %c0_i32_33 : i32
    %46 = arith.extui %45 : i1 to i32
    %c0_i32_34 = arith.constant 0 : i32
    %47 = arith.cmpi ne, %46, %c0_i32_34 : i32
    scf.if %47 {
      %c0_35 = arith.constant 0 : index
      %c0_36 = arith.constant 0 : index
      %c0_37 = arith.constant 0 : index
      %48 = vector.load %arg8[%c0_35, %c0_36, %c0_37] : memref<4x8x1xf32, #tpu.memory_space<vmem>>, vector<4x8x1xf32>
      %49 = tpu.reciprocal %48 {approx = true} : vector<4x8x1xf32> -> vector<4x8x1xf32>
      %c0_38 = arith.constant 0 : index
      %c0_39 = arith.constant 0 : index
      %c0_40 = arith.constant 0 : index
      %50 = vector.load %arg9[%c0_38, %c0_39, %c0_40] : memref<4x8x8xf32, #tpu.memory_space<vmem>>, vector<4x8x8xf32>
      %51 = vector.broadcast %49 : vector<4x8x1xf32> to vector<4x8x8xf32>
      %52 = arith.mulf %50, %51 : vector<4x8x8xf32>
      %53 = arith.truncf %52 : vector<4x8x8xf32> to vector<4x8x8xbf16>
      %c0_41 = arith.constant 0 : index
      %c0_42 = arith.constant 0 : index
      %c0_43 = arith.constant 0 : index
      %54 = vector.load %arg6[%c0_41, %c0_42, %c0_43] : memref<4x8x8xbf16, #tpu.memory_space<vmem>>, vector<4x8x8xbf16>
      tpu.vector_store %arg6[%c0_41, %c0_42, %c0_43], %53 {strides = array<i32>} : memref<4x8x8xbf16, #tpu.memory_space<vmem>>, vector<4x8x8xbf16>,
    } else {
    }
    return
  }
  func.func @transform_0(%arg0: i32, %arg1: i32, %arg2: i32) -> (i32, i32, i32) {
    %c0_i32 = arith.constant 0 : i32
    %c0_i32_0 = arith.constant 0 : i32
    return %arg0, %arg1, %c0_i32 : i32, i32, i32
  }
  func.func @transform_1(%arg0: i32, %arg1: i32, %arg2: i32) -> (i32, i32, i32) {
    %c0_i32 = arith.constant 0 : i32
    %c0_i32_0 = arith.constant 0 : i32
    return %arg0, %arg2, %c0_i32 : i32, i32, i32
  }
  func.func @transform_2(%arg0: i32, %arg1: i32, %arg2: i32) -> (i32, i32, i32) {
    %c0_i32 = arith.constant 0 : i32
    %c0_i32_0 = arith.constant 0 : i32
    return %arg0, %arg2, %c0_i32 : i32, i32, i32
  }
  func.func @transform_3(%arg0: i32, %arg1: i32, %arg2: i32) -> (i32, i32, i32) {
    %c0_i32 = arith.constant 0 : i32
    %c0_i32_0 = arith.constant 0 : i32
    return %arg0, %arg1, %c0_i32 : i32, i32, i32
  }
}

module attributes {stable_mosaic.version = 11 : i64} {
  func.func @_matmul_kernel(%arg0: i32, %arg1: i32, %arg2: i32, %arg3: memref<32x32xbf16, #tpu.memory_space<vmem>>, %arg4: memref<32x64xbf16, #tpu.memory_space<vmem>>, %arg5: memref<1x64xf32, #tpu.memory_space<vmem>>, %arg6: memref<32x64xbf16, #tpu.memory_space<vmem>>, %arg7: memref<32x64xf32, #tpu.memory_space<vmem>>) attributes {dimension_semantics = [#tpu.dimension_semantics<parallel>, #tpu.dimension_semantics<parallel>, #tpu.dimension_semantics<arbitrary>], iteration_bounds = array<i64: 1, 1, 1>, scalar_prefetch = 0 : i64, scratch_operands = 1 : i64, tpu.core_type = #tpu.core_type<tc>, window_params = [{transform_indices = @transform_0, window_bounds = array<i64: 32, 32>}, {transform_indices = @transform_1, window_bounds = array<i64: 32, 64>}, {transform_indices = @transform_2, window_bounds = array<i64: 1, 64>}, {transform_indices = @transform_3, window_bounds = array<i64: 32, 64>}]} {
    %c0_i32 = arith.constant 0 : i32
    %0 = arith.cmpi eq, %arg2, %c0_i32 : i32
    %1 = arith.extui %0 : i1 to i32
    %c0_i32_0 = arith.constant 0 : i32
    %2 = arith.cmpi ne, %1, %c0_i32_0 : i32
    scf.if %2 {
      %cst_10 = arith.constant 0.000000e+00 : f32
      %12 = vector.broadcast %cst_10 : f32 to vector<32x64xf32>
      %c0_11 = arith.constant 0 : index
      %c0_12 = arith.constant 0 : index
      %13 = vector.load %arg7[%c0_11, %c0_12] : memref<32x64xf32, #tpu.memory_space<vmem>>, vector<32x64xf32>
      tpu.vector_store %arg7[%c0_11, %c0_12], %12 {strides = array<i32>} : memref<32x64xf32, #tpu.memory_space<vmem>>, vector<32x64xf32>,
    } else {
    }
    %c0 = arith.constant 0 : index
    %c0_1 = arith.constant 0 : index
    %3 = vector.load %arg7[%c0, %c0_1] : memref<32x64xf32, #tpu.memory_space<vmem>>, vector<32x64xf32>
    %c0_2 = arith.constant 0 : index
    %c0_3 = arith.constant 0 : index
    %4 = vector.load %arg3[%c0_2, %c0_3] : memref<32x32xbf16, #tpu.memory_space<vmem>>, vector<32x32xbf16>
    %c0_4 = arith.constant 0 : index
    %c0_5 = arith.constant 0 : index
    %5 = vector.load %arg4[%c0_4, %c0_5] : memref<32x64xbf16, #tpu.memory_space<vmem>>, vector<32x64xbf16>
    %cst = arith.constant dense<0.000000e+00> : vector<32x64xf32>
    %6 = tpu.matmul %4, %5, %cst {dimension_numbers = #tpu.dot_dimension_numbers<[1], [0], [0], [1], [0, 0, 1, 1], [], []>} : vector<32x32xbf16>, vector<32x64xbf16>, vector<32x64xf32> -> vector<32x64xf32>
    %7 = arith.addf %3, %6 : vector<32x64xf32>
    %c0_6 = arith.constant 0 : index
    %c0_7 = arith.constant 0 : index
    %8 = vector.load %arg7[%c0_6, %c0_7] : memref<32x64xf32, #tpu.memory_space<vmem>>, vector<32x64xf32>
    tpu.vector_store %arg7[%c0_6, %c0_7], %7 {strides = array<i32>} : memref<32x64xf32, #tpu.memory_space<vmem>>, vector<32x64xf32>,
    %c0_i32_8 = arith.constant 0 : i32
    %9 = arith.cmpi eq, %arg2, %c0_i32_8 : i32
    %10 = arith.extui %9 : i1 to i32
    %c0_i32_9 = arith.constant 0 : i32
    %11 = arith.cmpi ne, %10, %c0_i32_9 : i32
    scf.if %11 {
      %c0_10 = arith.constant 0 : index
      %c0_11 = arith.constant 0 : index
      %12 = vector.load %arg7[%c0_10, %c0_11] : memref<32x64xf32, #tpu.memory_space<vmem>>, vector<32x64xf32>
      %c0_12 = arith.constant 0 : index
      %c0_13 = arith.constant 0 : index
      %13 = vector.load %arg5[%c0_12, %c0_13] : memref<1x64xf32, #tpu.memory_space<vmem>>, vector<1x64xf32>
      %14 = vector.broadcast %13 : vector<1x64xf32> to vector<32x64xf32>
      %15 = arith.addf %12, %14 : vector<32x64xf32>
      %16 = arith.truncf %15 : vector<32x64xf32> to vector<32x64xbf16>
      %c0_14 = arith.constant 0 : index
      %c0_15 = arith.constant 0 : index
      %17 = vector.load %arg6[%c0_14, %c0_15] : memref<32x64xbf16, #tpu.memory_space<vmem>>, vector<32x64xbf16>
      tpu.vector_store %arg6[%c0_14, %c0_15], %16 {strides = array<i32>} : memref<32x64xbf16, #tpu.memory_space<vmem>>, vector<32x64xbf16>,
    } else {
    }
    return
  }
  func.func @transform_0(%arg0: i32, %arg1: i32, %arg2: i32) -> (i32, i32) {
    %c0_i32 = arith.constant 0 : i32
    return %arg0, %arg2 : i32, i32
  }
  func.func @transform_1(%arg0: i32, %arg1: i32, %arg2: i32) -> (i32, i32) {
    %c0_i32 = arith.constant 0 : i32
    return %arg2, %arg1 : i32, i32
  }
  func.func @transform_2(%arg0: i32, %arg1: i32, %arg2: i32) -> (i32, i32) {
    %c0_i32 = arith.constant 0 : i32
    %c0_i32_0 = arith.constant 0 : i32
    return %c0_i32, %arg1 : i32, i32
  }
  func.func @transform_3(%arg0: i32, %arg1: i32, %arg2: i32) -> (i32, i32) {
    %c0_i32 = arith.constant 0 : i32
    return %arg0, %arg1 : i32, i32
  }
}

module attributes {stable_mosaic.version = 11 : i64} {
  func.func @_flash_attn_kernel(%arg0: i32, %arg1: i32, %arg2: i32, %arg3: memref<4x8x8xbf16, #tpu.memory_space<vmem>>, %arg4: memref<4x16x8xbf16, #tpu.memory_space<vmem>>, %arg5: memref<4x16x8xbf16, #tpu.memory_space<vmem>>, %arg6: memref<4x8x8xbf16, #tpu.memory_space<vmem>>, %arg7: memref<4x8x1xf32, #tpu.memory_space<vmem>>, %arg8: memref<4x8x1xf32, #tpu.memory_space<vmem>>, %arg9: memref<4x8x8xf32, #tpu.memory_space<vmem>>) attributes {dimension_semantics = [#tpu.dimension_semantics<parallel>, #tpu.dimension_semantics<parallel>, #tpu.dimension_semantics<arbitrary>], iteration_bounds = array<i64: 2, 1, 1>, scalar_prefetch = 0 : i64, scratch_operands = 3 : i64, tpu.core_type = #tpu.core_type<tc>, window_params = [{transform_indices = @transform_0, window_bounds = array<i64: 4, 8, 8>}, {transform_indices = @transform_1, window_bounds = array<i64: 4, 16, 8>}, {transform_indices = @transform_2, window_bounds = array<i64: 4, 16, 8>}, {transform_indices = @transform_3, window_bounds = array<i64: 4, 8, 8>}]} {
    %c0_i32 = arith.constant 0 : i32
    %0 = arith.cmpi eq, %arg2, %c0_i32 : i32
    %1 = arith.extui %0 : i1 to i32
    %c0_i32_0 = arith.constant 0 : i32
    %2 = arith.cmpi ne, %1, %c0_i32_0 : i32
    scf.if %2 {
      %cst_33 = arith.constant 0xFF800000 : f32
      %37 = vector.broadcast %cst_33 : f32 to vector<4x8x1xf32>
      %c0_34 = arith.constant 0 : index
      %c0_35 = arith.constant 0 : index
      %c0_36 = arith.constant 0 : index
      %38 = vector.load %arg7[%c0_34, %c0_35, %c0_36] : memref<4x8x1xf32, #tpu.memory_space<vmem>>, vector<4x8x1xf32>
      tpu.vector_store %arg7[%c0_34, %c0_35, %c0_36], %37 {strides = array<i32>} : memref<4x8x1xf32, #tpu.memory_space<vmem>>, vector<4x8x1xf32>,
      %cst_37 = arith.constant 0.000000e+00 : f32
      %39 = vector.broadcast %cst_37 : f32 to vector<4x8x1xf32>
      %c0_38 = arith.constant 0 : index
      %c0_39 = arith.constant 0 : index
      %c0_40 = arith.constant 0 : index
      %40 = vector.load %arg8[%c0_38, %c0_39, %c0_40] : memref<4x8x1xf32, #tpu.memory_space<vmem>>, vector<4x8x1xf32>
      tpu.vector_store %arg8[%c0_38, %c0_39, %c0_40], %39 {strides = array<i32>} : memref<4x8x1xf32, #tpu.memory_space<vmem>>, vector<4x8x1xf32>,
      %cst_41 = arith.constant 0.000000e+00 : f32
      %41 = vector.broadcast %cst_41 : f32 to vector<4x8x8xf32>
      %c0_42 = arith.constant 0 : index
      %c0_43 = arith.constant 0 : index
      %c0_44 = arith.constant 0 : index
      %42 = vector.load %arg9[%c0_42, %c0_43, %c0_44] : memref<4x8x8xf32, #tpu.memory_space<vmem>>, vector<4x8x8xf32>
      tpu.vector_store %arg9[%c0_42, %c0_43, %c0_44], %41 {strides = array<i32>} : memref<4x8x8xf32, #tpu.memory_space<vmem>>, vector<4x8x8xf32>,
    } else {
    }
    %c0 = arith.constant 0 : index
    %c0_1 = arith.constant 0 : index
    %c0_2 = arith.constant 0 : index
    %3 = vector.load %arg3[%c0, %c0_1, %c0_2] : memref<4x8x8xbf16, #tpu.memory_space<vmem>>, vector<4x8x8xbf16>
    %4 = arith.extf %3 : vector<4x8x8xbf16> to vector<4x8x8xf32>
    %cst = arith.constant 0.353553385 : f32
    %5 = vector.broadcast %cst : f32 to vector<4x8x8xf32>
    %6 = arith.mulf %4, %5 : vector<4x8x8xf32>
    %7 = arith.truncf %6 : vector<4x8x8xf32> to vector<4x8x8xbf16>
    %c0_3 = arith.constant 0 : index
    %c0_4 = arith.constant 0 : index
    %c0_5 = arith.constant 0 : index
    %8 = vector.load %arg4[%c0_3, %c0_4, %c0_5] : memref<4x16x8xbf16, #tpu.memory_space<vmem>>, vector<4x16x8xbf16>
    "tpu.trace_start"() <{level = 10 : i32, message = "hqd,hkd->hqk"}> : () -> ()
    %cst_6 = arith.constant dense<0.000000e+00> : vector<4x8x16xf32>
    %9 = tpu.matmul %7, %8, %cst_6 {dimension_numbers = #tpu.dot_dimension_numbers<[2], [2], [1], [1], [0, 0, 0, 1, 1, 1], [0], [0]>} : vector<4x8x8xbf16>, vector<4x16x8xbf16>, vector<4x8x16xf32> -> vector<4x8x16xf32>
    "tpu.trace_stop"() : () -> ()
    %c0_7 = arith.constant 0 : index
    %c0_8 = arith.constant 0 : index
    %c0_9 = arith.constant 0 : index
    %10 = vector.load %arg7[%c0_7, %c0_8, %c0_9] : memref<4x8x1xf32, #tpu.memory_space<vmem>>, vector<4x8x1xf32>
    %cst_10 = arith.constant dense<0xFF800000> : vector<4x8xf32>
    %11 = vector.multi_reduction <maximumf>, %9, %cst_10 [2] : vector<4x8x16xf32> to vector<4x8xf32>
    %12 = vector.shape_cast %11 : vector<4x8xf32> to vector<4x8x1xf32>
    %13 = arith.maximumf %10, %12 : vector<4x8x1xf32>
    %14 = arith.subf %10, %13 : vector<4x8x1xf32>
    %15 = math.exp %14 : vector<4x8x1xf32>
    %16 = vector.broadcast %13 : vector<4x8x1xf32> to vector<4x8x16xf32>
    %17 = arith.subf %9, %16 : vector<4x8x16xf32>
    %18 = math.exp %17 : vector<4x8x16xf32>
    %c0_11 = arith.constant 0 : index
    %c0_12 = arith.constant 0 : index
    %c0_13 = arith.constant 0 : index
    %19 = vector.load %arg8[%c0_11, %c0_12, %c0_13] : memref<4x8x1xf32, #tpu.memory_space<vmem>>, vector<4x8x1xf32>
    %20 = arith.mulf %15, %19 : vector<4x8x1xf32>
    %cst_14 = arith.constant dense<0.000000e+00> : vector<4x8xf32>
    %21 = vector.multi_reduction <add>, %18, %cst_14 [2] : vector<4x8x16xf32> to vector<4x8xf32>
    %22 = vector.shape_cast %21 : vector<4x8xf32> to vector<4x8x1xf32>
    %23 = arith.addf %20, %22 : vector<4x8x1xf32>
    %c0_15 = arith.constant 0 : index
    %c0_16 = arith.constant 0 : index
    %c0_17 = arith.constant 0 : index
    %24 = vector.load %arg8[%c0_15, %c0_16, %c0_17] : memref<4x8x1xf32, #tpu.memory_space<vmem>>, vector<4x8x1xf32>
    tpu.vector_store %arg8[%c0_15, %c0_16, %c0_17], %23 {strides = array<i32>} : memref<4x8x1xf32, #tpu.memory_space<vmem>>, vector<4x8x1xf32>,
    %c0_18 = arith.constant 0 : index
    %c0_19 = arith.constant 0 : index
    %c0_20 = arith.constant 0 : index
    %25 = vector.load %arg9[%c0_18, %c0_19, %c0_20] : memref<4x8x8xf32, #tpu.memory_space<vmem>>, vector<4x8x8xf32>
    %26 = vector.broadcast %15 : vector<4x8x1xf32> to vector<4x8x8xf32>
    %27 = arith.mulf %26, %25 : vector<4x8x8xf32>
    %28 = arith.truncf %18 : vector<4x8x16xf32> to vector<4x8x16xbf16>
    %c0_21 = arith.constant 0 : index
    %c0_22 = arith.constant 0 : index
    %c0_23 = arith.constant 0 : index
    %29 = vector.load %arg5[%c0_21, %c0_22, %c0_23] : memref<4x16x8xbf16, #tpu.memory_space<vmem>>, vector<4x16x8xbf16>
    "tpu.trace_start"() <{level = 10 : i32, message = "hqk,hkd->hqd"}> : () -> ()
    %cst_24 = arith.constant dense<0.000000e+00> : vector<4x8x8xf32>
    %30 = tpu.matmul %28, %29, %cst_24 {dimension_numbers = #tpu.dot_dimension_numbers<[2], [1], [1], [2], [0, 0, 0, 1, 1, 2], [0], [0]>} : vector<4x8x16xbf16>, vector<4x16x8xbf16>, vector<4x8x8xf32> -> vector<4x8x8xf32>
    "tpu.trace_stop"() : () -> ()
    %31 = arith.addf %27, %30 : vector<4x8x8xf32>
    %c0_25 = arith.constant 0 : index
    %c0_26 = arith.constant 0 : index
    %c0_27 = arith.constant 0 : index
    %32 = vector.load %arg9[%c0_25, %c0_26, %c0_27] : memref<4x8x8xf32, #tpu.memory_space<vmem>>, vector<4x8x8xf32>
    tpu.vector_store %arg9[%c0_25, %c0_26, %c0_27], %31 {strides = array<i32>} : memref<4x8x8xf32, #tpu.memory_space<vmem>>, vector<4x8x8xf32>,
    %c0_28 = arith.constant 0 : index
    %c0_29 = arith.constant 0 : index
    %c0_30 = arith.constant 0 : index
    %33 = vector.load %arg7[%c0_28, %c0_29, %c0_30] : memref<4x8x1xf32, #tpu.memory_space<vmem>>, vector<4x8x1xf32>
    tpu.vector_store %arg7[%c0_28, %c0_29, %c0_30], %13 {strides = array<i32>} : memref<4x8x1xf32, #tpu.memory_space<vmem>>, vector<4x8x1xf32>,
    %c0_i32_31 = arith.constant 0 : i32
    %34 = arith.cmpi eq, %arg2, %c0_i32_31 : i32
    %35 = arith.extui %34 : i1 to i32
    %c0_i32_32 = arith.constant 0 : i32
    %36 = arith.cmpi ne, %35, %c0_i32_32 : i32
    scf.if %36 {
      %c0_33 = arith.constant 0 : index
      %c0_34 = arith.constant 0 : index
      %c0_35 = arith.constant 0 : index
      %37 = vector.load %arg8[%c0_33, %c0_34, %c0_35] : memref<4x8x1xf32, #tpu.memory_space<vmem>>, vector<4x8x1xf32>
      %38 = tpu.reciprocal %37 {approx = true} : vector<4x8x1xf32> -> vector<4x8x1xf32>
      %c0_36 = arith.constant 0 : index
      %c0_37 = arith.constant 0 : index
      %c0_38 = arith.constant 0 : index
      %39 = vector.load %arg9[%c0_36, %c0_37, %c0_38] : memref<4x8x8xf32, #tpu.memory_space<vmem>>, vector<4x8x8xf32>
      %40 = vector.broadcast %38 : vector<4x8x1xf32> to vector<4x8x8xf32>
      %41 = arith.mulf %39, %40 : vector<4x8x8xf32>
      %42 = arith.truncf %41 : vector<4x8x8xf32> to vector<4x8x8xbf16>
      %c0_39 = arith.constant 0 : index
      %c0_40 = arith.constant 0 : index
      %c0_41 = arith.constant 0 : index
      %43 = vector.load %arg6[%c0_39, %c0_40, %c0_41] : memref<4x8x8xbf16, #tpu.memory_space<vmem>>, vector<4x8x8xbf16>
      tpu.vector_store %arg6[%c0_39, %c0_40, %c0_41], %42 {strides = array<i32>} : memref<4x8x8xbf16, #tpu.memory_space<vmem>>, vector<4x8x8xbf16>,
    } else {
    }
    return
  }
  func.func @transform_0(%arg0: i32, %arg1: i32, %arg2: i32) -> (i32, i32, i32) {
    %c0_i32 = arith.constant 0 : i32
    %c0_i32_0 = arith.constant 0 : i32
    return %arg0, %arg1, %c0_i32 : i32, i32, i32
  }
  func.func @transform_1(%arg0: i32, %arg1: i32, %arg2: i32) -> (i32, i32, i32) {
    %c0_i32 = arith.constant 0 : i32
    %c0_i32_0 = arith.constant 0 : i32
    return %arg0, %arg2, %c0_i32 : i32, i32, i32
  }
  func.func @transform_2(%arg0: i32, %arg1: i32, %arg2: i32) -> (i32, i32, i32) {
    %c0_i32 = arith.constant 0 : i32
    %c0_i32_0 = arith.constant 0 : i32
    return %arg0, %arg2, %c0_i32 : i32, i32, i32
  }
  func.func @transform_3(%arg0: i32, %arg1: i32, %arg2: i32) -> (i32, i32, i32) {
    %c0_i32 = arith.constant 0 : i32
    %c0_i32_0 = arith.constant 0 : i32
    return %arg0, %arg1, %c0_i32 : i32, i32, i32
  }
}

module attributes {stable_mosaic.version = 11 : i64} {
  func.func @_matmul_res_kernel(%arg0: i32, %arg1: i32, %arg2: i32, %arg3: memref<16x128xbf16, #tpu.memory_space<vmem>>, %arg4: memref<128x32xbf16, #tpu.memory_space<vmem>>, %arg5: memref<1x32xf32, #tpu.memory_space<vmem>>, %arg6: memref<16x32xbf16, #tpu.memory_space<vmem>>, %arg7: memref<16x32xbf16, #tpu.memory_space<vmem>>, %arg8: memref<16x32xf32, #tpu.memory_space<vmem>>) attributes {dimension_semantics = [#tpu.dimension_semantics<parallel>, #tpu.dimension_semantics<parallel>, #tpu.dimension_semantics<arbitrary>], iteration_bounds = array<i64: 1, 1, 1>, scalar_prefetch = 0 : i64, scratch_operands = 1 : i64, tpu.core_type = #tpu.core_type<tc>, window_params = [{transform_indices = @transform_0, window_bounds = array<i64: 16, 128>}, {transform_indices = @transform_1, window_bounds = array<i64: 128, 32>}, {transform_indices = @transform_2, window_bounds = array<i64: 1, 32>}, {transform_indices = @transform_3, window_bounds = array<i64: 16, 32>}, {transform_indices = @transform_4, window_bounds = array<i64: 16, 32>}]} {
    %c0_i32 = arith.constant 0 : i32
    %0 = arith.cmpi eq, %arg2, %c0_i32 : i32
    %1 = arith.extui %0 : i1 to i32
    %c0_i32_0 = arith.constant 0 : i32
    %2 = arith.cmpi ne, %1, %c0_i32_0 : i32
    scf.if %2 {
      %cst_10 = arith.constant 0.000000e+00 : f32
      %12 = vector.broadcast %cst_10 : f32 to vector<16x32xf32>
      %c0_11 = arith.constant 0 : index
      %c0_12 = arith.constant 0 : index
      %13 = vector.load %arg8[%c0_11, %c0_12] : memref<16x32xf32, #tpu.memory_space<vmem>>, vector<16x32xf32>
      tpu.vector_store %arg8[%c0_11, %c0_12], %12 {strides = array<i32>} : memref<16x32xf32, #tpu.memory_space<vmem>>, vector<16x32xf32>,
    } else {
    }
    %c0 = arith.constant 0 : index
    %c0_1 = arith.constant 0 : index
    %3 = vector.load %arg8[%c0, %c0_1] : memref<16x32xf32, #tpu.memory_space<vmem>>, vector<16x32xf32>
    %c0_2 = arith.constant 0 : index
    %c0_3 = arith.constant 0 : index
    %4 = vector.load %arg3[%c0_2, %c0_3] : memref<16x128xbf16, #tpu.memory_space<vmem>>, vector<16x128xbf16>
    %c0_4 = arith.constant 0 : index
    %c0_5 = arith.constant 0 : index
    %5 = vector.load %arg4[%c0_4, %c0_5] : memref<128x32xbf16, #tpu.memory_space<vmem>>, vector<128x32xbf16>
    %cst = arith.constant dense<0.000000e+00> : vector<16x32xf32>
    %6 = tpu.matmul %4, %5, %cst {dimension_numbers = #tpu.dot_dimension_numbers<[1], [0], [0], [1], [0, 0, 1, 1], [], []>} : vector<16x128xbf16>, vector<128x32xbf16>, vector<16x32xf32> -> vector<16x32xf32>
    %7 = arith.addf %3, %6 : vector<16x32xf32>
    %c0_6 = arith.constant 0 : index
    %c0_7 = arith.constant 0 : index
    %8 = vector.load %arg8[%c0_6, %c0_7] : memref<16x32xf32, #tpu.memory_space<vmem>>, vector<16x32xf32>
    tpu.vector_store %arg8[%c0_6, %c0_7], %7 {strides = array<i32>} : memref<16x32xf32, #tpu.memory_space<vmem>>, vector<16x32xf32>,
    %c0_i32_8 = arith.constant 0 : i32
    %9 = arith.cmpi eq, %arg2, %c0_i32_8 : i32
    %10 = arith.extui %9 : i1 to i32
    %c0_i32_9 = arith.constant 0 : i32
    %11 = arith.cmpi ne, %10, %c0_i32_9 : i32
    scf.if %11 {
      %c0_10 = arith.constant 0 : index
      %c0_11 = arith.constant 0 : index
      %12 = vector.load %arg8[%c0_10, %c0_11] : memref<16x32xf32, #tpu.memory_space<vmem>>, vector<16x32xf32>
      %c0_12 = arith.constant 0 : index
      %c0_13 = arith.constant 0 : index
      %13 = vector.load %arg5[%c0_12, %c0_13] : memref<1x32xf32, #tpu.memory_space<vmem>>, vector<1x32xf32>
      %14 = vector.broadcast %13 : vector<1x32xf32> to vector<16x32xf32>
      %15 = arith.addf %12, %14 : vector<16x32xf32>
      %c0_14 = arith.constant 0 : index
      %c0_15 = arith.constant 0 : index
      %16 = vector.load %arg6[%c0_14, %c0_15] : memref<16x32xbf16, #tpu.memory_space<vmem>>, vector<16x32xbf16>
      %17 = arith.extf %16 : vector<16x32xbf16> to vector<16x32xf32>
      %18 = arith.addf %15, %17 : vector<16x32xf32>
      %19 = arith.truncf %18 : vector<16x32xf32> to vector<16x32xbf16>
      %c0_16 = arith.constant 0 : index
      %c0_17 = arith.constant 0 : index
      %20 = vector.load %arg7[%c0_16, %c0_17] : memref<16x32xbf16, #tpu.memory_space<vmem>>, vector<16x32xbf16>
      tpu.vector_store %arg7[%c0_16, %c0_17], %19 {strides = array<i32>} : memref<16x32xbf16, #tpu.memory_space<vmem>>, vector<16x32xbf16>,
    } else {
    }
    return
  }
  func.func @transform_0(%arg0: i32, %arg1: i32, %arg2: i32) -> (i32, i32) {
    %c0_i32 = arith.constant 0 : i32
    return %arg0, %arg2 : i32, i32
  }
  func.func @transform_1(%arg0: i32, %arg1: i32, %arg2: i32) -> (i32, i32) {
    %c0_i32 = arith.constant 0 : i32
    return %arg2, %arg1 : i32, i32
  }
  func.func @transform_2(%arg0: i32, %arg1: i32, %arg2: i32) -> (i32, i32) {
    %c0_i32 = arith.constant 0 : i32
    %c0_i32_0 = arith.constant 0 : i32
    return %c0_i32, %arg1 : i32, i32
  }
  func.func @transform_3(%arg0: i32, %arg1: i32, %arg2: i32) -> (i32, i32) {
    %c0_i32 = arith.constant 0 : i32
    return %arg0, %arg1 : i32, i32
  }
  func.func @transform_4(%arg0: i32, %arg1: i32, %arg2: i32) -> (i32, i32) {
    %c0_i32 = arith.constant 0 : i32
    return %arg0, %arg1 : i32, i32
  }
}

module attributes {stable_mosaic.version = 11 : i64} {
  func.func @_ln_matmul_kernel(%arg0: i32, %arg1: i32, %arg2: memref<16x32xbf16, #tpu.memory_space<vmem>>, %arg3: memref<1x32xf32, #tpu.memory_space<vmem>>, %arg4: memref<1x32xf32, #tpu.memory_space<vmem>>, %arg5: memref<32x128xbf16, #tpu.memory_space<vmem>>, %arg6: memref<1x128xf32, #tpu.memory_space<vmem>>, %arg7: memref<16x128xbf16, #tpu.memory_space<vmem>>) attributes {dimension_semantics = [#tpu.dimension_semantics<parallel>, #tpu.dimension_semantics<parallel>], iteration_bounds = array<i64: 1, 1>, scalar_prefetch = 0 : i64, scratch_operands = 0 : i64, tpu.core_type = #tpu.core_type<tc>, window_params = [{transform_indices = @transform_0, window_bounds = array<i64: 16, 32>}, {pipeline_mode = #tpu.pipeline_mode<synchronous>, transform_indices = @transform_1, window_bounds = array<i64: 1, 32>}, {pipeline_mode = #tpu.pipeline_mode<synchronous>, transform_indices = @transform_2, window_bounds = array<i64: 1, 32>}, {transform_indices = @transform_3, window_bounds = array<i64: 32, 128>}, {transform_indices = @transform_4, window_bounds = array<i64: 1, 128>}, {transform_indices = @transform_5, window_bounds = array<i64: 16, 128>}]} {
    %c0 = arith.constant 0 : index
    %c0_0 = arith.constant 0 : index
    %0 = vector.load %arg2[%c0, %c0_0] : memref<16x32xbf16, #tpu.memory_space<vmem>>, vector<16x32xbf16>
    %1 = arith.extf %0 : vector<16x32xbf16> to vector<16x32xf32>
    %cst = arith.constant dense<0.000000e+00> : vector<16xf32>
    %2 = vector.multi_reduction <add>, %1, %cst [1] : vector<16x32xf32> to vector<16xf32>
    %3 = vector.shape_cast %2 : vector<16xf32> to vector<16x1xf32>
    %cst_1 = arith.constant 3.200000e+01 : f32
    %4 = vector.broadcast %cst_1 : f32 to vector<16x1xf32>
    %5 = arith.divf %3, %4 : vector<16x1xf32>
    %6 = vector.broadcast %5 : vector<16x1xf32> to vector<16x32xf32>
    %7 = arith.subf %1, %6 : vector<16x32xf32>
    %8 = arith.mulf %7, %7 : vector<16x32xf32>
    %cst_2 = arith.constant dense<0.000000e+00> : vector<16xf32>
    %9 = vector.multi_reduction <add>, %8, %cst_2 [1] : vector<16x32xf32> to vector<16xf32>
    %10 = vector.shape_cast %9 : vector<16xf32> to vector<16x1xf32>
    %cst_3 = arith.constant 3.200000e+01 : f32
    %11 = vector.broadcast %cst_3 : f32 to vector<16x1xf32>
    %12 = arith.divf %10, %11 : vector<16x1xf32>
    %13 = vector.broadcast %5 : vector<16x1xf32> to vector<16x32xf32>
    %14 = arith.subf %1, %13 : vector<16x32xf32>
    %cst_4 = arith.constant 9.99999974E-6 : f32
    %15 = vector.broadcast %cst_4 : f32 to vector<16x1xf32>
    %16 = arith.addf %12, %15 : vector<16x1xf32>
    %17 = math.rsqrt %16 : vector<16x1xf32>
    %18 = vector.broadcast %17 : vector<16x1xf32> to vector<16x32xf32>
    %19 = arith.mulf %14, %18 : vector<16x32xf32>
    %c0_5 = arith.constant 0 : index
    %c0_6 = arith.constant 0 : index
    %20 = vector.load %arg3[%c0_5, %c0_6] : memref<1x32xf32, #tpu.memory_space<vmem>>, vector<1x32xf32>
    %21 = vector.broadcast %20 : vector<1x32xf32> to vector<16x32xf32>
    %22 = arith.mulf %19, %21 : vector<16x32xf32>
    %c0_7 = arith.constant 0 : index
    %c0_8 = arith.constant 0 : index
    %23 = vector.load %arg4[%c0_7, %c0_8] : memref<1x32xf32, #tpu.memory_space<vmem>>, vector<1x32xf32>
    %24 = vector.broadcast %23 : vector<1x32xf32> to vector<16x32xf32>
    %25 = arith.addf %22, %24 : vector<16x32xf32>
    %26 = arith.truncf %25 : vector<16x32xf32> to vector<16x32xbf16>
    %c0_9 = arith.constant 0 : index
    %c0_10 = arith.constant 0 : index
    %27 = vector.load %arg5[%c0_9, %c0_10] : memref<32x128xbf16, #tpu.memory_space<vmem>>, vector<32x128xbf16>
    %cst_11 = arith.constant dense<0.000000e+00> : vector<16x128xf32>
    %28 = tpu.matmul %26, %27, %cst_11 {dimension_numbers = #tpu.dot_dimension_numbers<[1], [0], [0], [1], [0, 0, 1, 1], [], []>} : vector<16x32xbf16>, vector<32x128xbf16>, vector<16x128xf32> -> vector<16x128xf32>
    %c0_12 = arith.constant 0 : index
    %c0_13 = arith.constant 0 : index
    %29 = vector.load %arg6[%c0_12, %c0_13] : memref<1x128xf32, #tpu.memory_space<vmem>>, vector<1x128xf32>
    %30 = vector.broadcast %29 : vector<1x128xf32> to vector<16x128xf32>
    %31 = arith.addf %28, %30 : vector<16x128xf32>
    %32 = arith.mulf %31, %31 : vector<16x128xf32>
    %33 = arith.mulf %31, %32 : vector<16x128xf32>
    %cst_14 = arith.constant 4.471500e-02 : f32
    %34 = vector.broadcast %cst_14 : f32 to vector<16x128xf32>
    %35 = arith.mulf %34, %33 : vector<16x128xf32>
    %36 = arith.addf %31, %35 : vector<16x128xf32>
    %cst_15 = arith.constant 0.797884583 : f32
    %37 = vector.broadcast %cst_15 : f32 to vector<16x128xf32>
    %38 = arith.mulf %37, %36 : vector<16x128xf32>
    %39 = math.tanh %38 : vector<16x128xf32>
    %cst_16 = arith.constant 1.000000e+00 : f32
    %40 = vector.broadcast %cst_16 : f32 to vector<16x128xf32>
    %41 = arith.addf %40, %39 : vector<16x128xf32>
    %cst_17 = arith.constant 5.000000e-01 : f32
    %42 = vector.broadcast %cst_17 : f32 to vector<16x128xf32>
    %43 = arith.mulf %42, %41 : vector<16x128xf32>
    %44 = arith.mulf %31, %43 : vector<16x128xf32>
    %45 = arith.truncf %44 : vector<16x128xf32> to vector<16x128xbf16>
    %c0_18 = arith.constant 0 : index
    %c0_19 = arith.constant 0 : index
    %46 = vector.load %arg7[%c0_18, %c0_19] : memref<16x128xbf16, #tpu.memory_space<vmem>>, vector<16x128xbf16>
    tpu.vector_store %arg7[%c0_18, %c0_19], %45 {strides = array<i32>} : memref<16x128xbf16, #tpu.memory_space<vmem>>, vector<16x128xbf16>,
    return
  }
  func.func @transform_0(%arg0: i32, %arg1: i32) -> (i32, i32) {
    %c0_i32 = arith.constant 0 : i32
    %c0_i32_0 = arith.constant 0 : i32
    return %arg0, %c0_i32 : i32, i32
  }
  func.func @transform_1(%arg0: i32, %arg1: i32) -> (i32, i32) {
    %c0_i32 = arith.constant 0 : i32
    %c0_i32_0 = arith.constant 0 : i32
    %c0_i32_1 = arith.constant 0 : i32
    return %c0_i32, %c0_i32_0 : i32, i32
  }
  func.func @transform_2(%arg0: i32, %arg1: i32) -> (i32, i32) {
    %c0_i32 = arith.constant 0 : i32
    %c0_i32_0 = arith.constant 0 : i32
    %c0_i32_1 = arith.constant 0 : i32
    return %c0_i32, %c0_i32_0 : i32, i32
  }
  func.func @transform_3(%arg0: i32, %arg1: i32) -> (i32, i32) {
    %c0_i32 = arith.constant 0 : i32
    %c0_i32_0 = arith.constant 0 : i32
    return %c0_i32, %arg1 : i32, i32
  }
  func.func @transform_4(%arg0: i32, %arg1: i32) -> (i32, i32) {
    %c0_i32 = arith.constant 0 : i32
    %c0_i32_0 = arith.constant 0 : i32
    return %c0_i32, %arg1 : i32, i32
  }
  func.func @transform_5(%arg0: i32, %arg1: i32) -> (i32, i32) {
    %c0_i32 = arith.constant 0 : i32
    return %arg0, %arg1 : i32, i32
  }
}

module attributes {stable_mosaic.version = 11 : i64} {
  func.func @_ln_matmul_kernel(%arg0: i32, %arg1: i32, %arg2: memref<16x32xbf16, #tpu.memory_space<vmem>>, %arg3: memref<1x32xf32, #tpu.memory_space<vmem>>, %arg4: memref<1x32xf32, #tpu.memory_space<vmem>>, %arg5: memref<32x64xbf16, #tpu.memory_space<vmem>>, %arg6: memref<1x64xf32, #tpu.memory_space<vmem>>, %arg7: memref<16x64xf32, #tpu.memory_space<vmem>>) attributes {dimension_semantics = [#tpu.dimension_semantics<parallel>, #tpu.dimension_semantics<parallel>], iteration_bounds = array<i64: 1, 1>, scalar_prefetch = 0 : i64, scratch_operands = 0 : i64, tpu.core_type = #tpu.core_type<tc>, window_params = [{transform_indices = @transform_0, window_bounds = array<i64: 16, 32>}, {pipeline_mode = #tpu.pipeline_mode<synchronous>, transform_indices = @transform_1, window_bounds = array<i64: 1, 32>}, {pipeline_mode = #tpu.pipeline_mode<synchronous>, transform_indices = @transform_2, window_bounds = array<i64: 1, 32>}, {transform_indices = @transform_3, window_bounds = array<i64: 32, 64>}, {transform_indices = @transform_4, window_bounds = array<i64: 1, 64>}, {transform_indices = @transform_5, window_bounds = array<i64: 16, 64>}]} {
    %c0 = arith.constant 0 : index
    %c0_0 = arith.constant 0 : index
    %0 = vector.load %arg2[%c0, %c0_0] : memref<16x32xbf16, #tpu.memory_space<vmem>>, vector<16x32xbf16>
    %1 = arith.extf %0 : vector<16x32xbf16> to vector<16x32xf32>
    %cst = arith.constant dense<0.000000e+00> : vector<16xf32>
    %2 = vector.multi_reduction <add>, %1, %cst [1] : vector<16x32xf32> to vector<16xf32>
    %3 = vector.shape_cast %2 : vector<16xf32> to vector<16x1xf32>
    %cst_1 = arith.constant 3.200000e+01 : f32
    %4 = vector.broadcast %cst_1 : f32 to vector<16x1xf32>
    %5 = arith.divf %3, %4 : vector<16x1xf32>
    %6 = vector.broadcast %5 : vector<16x1xf32> to vector<16x32xf32>
    %7 = arith.subf %1, %6 : vector<16x32xf32>
    %8 = arith.mulf %7, %7 : vector<16x32xf32>
    %cst_2 = arith.constant dense<0.000000e+00> : vector<16xf32>
    %9 = vector.multi_reduction <add>, %8, %cst_2 [1] : vector<16x32xf32> to vector<16xf32>
    %10 = vector.shape_cast %9 : vector<16xf32> to vector<16x1xf32>
    %cst_3 = arith.constant 3.200000e+01 : f32
    %11 = vector.broadcast %cst_3 : f32 to vector<16x1xf32>
    %12 = arith.divf %10, %11 : vector<16x1xf32>
    %13 = vector.broadcast %5 : vector<16x1xf32> to vector<16x32xf32>
    %14 = arith.subf %1, %13 : vector<16x32xf32>
    %cst_4 = arith.constant 9.99999974E-6 : f32
    %15 = vector.broadcast %cst_4 : f32 to vector<16x1xf32>
    %16 = arith.addf %12, %15 : vector<16x1xf32>
    %17 = math.rsqrt %16 : vector<16x1xf32>
    %18 = vector.broadcast %17 : vector<16x1xf32> to vector<16x32xf32>
    %19 = arith.mulf %14, %18 : vector<16x32xf32>
    %c0_5 = arith.constant 0 : index
    %c0_6 = arith.constant 0 : index
    %20 = vector.load %arg3[%c0_5, %c0_6] : memref<1x32xf32, #tpu.memory_space<vmem>>, vector<1x32xf32>
    %21 = vector.broadcast %20 : vector<1x32xf32> to vector<16x32xf32>
    %22 = arith.mulf %19, %21 : vector<16x32xf32>
    %c0_7 = arith.constant 0 : index
    %c0_8 = arith.constant 0 : index
    %23 = vector.load %arg4[%c0_7, %c0_8] : memref<1x32xf32, #tpu.memory_space<vmem>>, vector<1x32xf32>
    %24 = vector.broadcast %23 : vector<1x32xf32> to vector<16x32xf32>
    %25 = arith.addf %22, %24 : vector<16x32xf32>
    %26 = arith.truncf %25 : vector<16x32xf32> to vector<16x32xbf16>
    %c0_9 = arith.constant 0 : index
    %c0_10 = arith.constant 0 : index
    %27 = vector.load %arg5[%c0_9, %c0_10] : memref<32x64xbf16, #tpu.memory_space<vmem>>, vector<32x64xbf16>
    %cst_11 = arith.constant dense<0.000000e+00> : vector<16x64xf32>
    %28 = tpu.matmul %26, %27, %cst_11 {dimension_numbers = #tpu.dot_dimension_numbers<[1], [0], [0], [1], [0, 0, 1, 1], [], []>} : vector<16x32xbf16>, vector<32x64xbf16>, vector<16x64xf32> -> vector<16x64xf32>
    %c0_12 = arith.constant 0 : index
    %c0_13 = arith.constant 0 : index
    %29 = vector.load %arg6[%c0_12, %c0_13] : memref<1x64xf32, #tpu.memory_space<vmem>>, vector<1x64xf32>
    %30 = vector.broadcast %29 : vector<1x64xf32> to vector<16x64xf32>
    %31 = arith.addf %28, %30 : vector<16x64xf32>
    %c0_14 = arith.constant 0 : index
    %c0_15 = arith.constant 0 : index
    %32 = vector.load %arg7[%c0_14, %c0_15] : memref<16x64xf32, #tpu.memory_space<vmem>>, vector<16x64xf32>
    tpu.vector_store %arg7[%c0_14, %c0_15], %31 {strides = array<i32>} : memref<16x64xf32, #tpu.memory_space<vmem>>, vector<16x64xf32>,
    return
  }
  func.func @transform_0(%arg0: i32, %arg1: i32) -> (i32, i32) {
    %c0_i32 = arith.constant 0 : i32
    %c0_i32_0 = arith.constant 0 : i32
    return %arg0, %c0_i32 : i32, i32
  }
  func.func @transform_1(%arg0: i32, %arg1: i32) -> (i32, i32) {
    %c0_i32 = arith.constant 0 : i32
    %c0_i32_0 = arith.constant 0 : i32
    %c0_i32_1 = arith.constant 0 : i32
    return %c0_i32, %c0_i32_0 : i32, i32
  }
  func.func @transform_2(%arg0: i32, %arg1: i32) -> (i32, i32) {
    %c0_i32 = arith.constant 0 : i32
    %c0_i32_0 = arith.constant 0 : i32
    %c0_i32_1 = arith.constant 0 : i32
    return %c0_i32, %c0_i32_0 : i32, i32
  }
  func.func @transform_3(%arg0: i32, %arg1: i32) -> (i32, i32) {
    %c0_i32 = arith.constant 0 : i32
    %c0_i32_0 = arith.constant 0 : i32
    return %c0_i32, %arg1 : i32, i32
  }
  func.func @transform_4(%arg0: i32, %arg1: i32) -> (i32, i32) {
    %c0_i32 = arith.constant 0 : i32
    %c0_i32_0 = arith.constant 0 : i32
    return %c0_i32, %arg1 : i32, i32
  }
  func.func @transform_5(%arg0: i32, %arg1: i32) -> (i32, i32) {
    %c0_i32 = arith.constant 0 : i32
    return %arg0, %arg1 : i32, i32
  }
}

</mosaic_0001>

<bundles_post_ra>
// kernel: text_decoder_forward.19
= control target key start
LH: loop header
LB: loop body
LE: loop exit
PB: predicated region body
PF: predicated region fallthrough
CT: control target
= control target key end

     0   :  { %vm25_vm0 = vcmask 261120   ;;  %v161_v5 = vmov 32.0   ;;  %vm129_vm8 = vcmask 781312   ;;  %s221_s0 = inlined_call_operand.vmem [shape: bf16[16,32], index: 0, kind: input, shape index: {}]   ;;  %s222_s1 = inlined_call_operand.vmem [shape: f32[1,32], index: 1, kind: input, shape index: {}]   ;;  %s223_s2 = inlined_call_operand.vmem [shape: f32[1,32], index: 2, kind: input, shape index: {}]   ;;  %s224_s4 = inlined_call_operand.vmem [shape: f32[1,96], index: 4, kind: input, shape index: {}]   ;;  %s225_s3 = inlined_call_operand.vmem [shape: bf16[32,96], index: 3, kind: input, shape index: {}]   ;;  %s226_s5 = inlined_call_operand.vmem [shape: bf16[16,96], index: 5, kind: output, shape index: {}]  }
   0x1   :  { %v148_v0 = vld [vmem:[%s221_s0] sm:$0xff]   ;;  %155 = vrcp.f32 %v161_v5  ;;  %v146_v22 = vld [vmem:[%s225_s3 + $0x8] sm:$0xff] }
   0x2   :  { %v149_v1 = vunpack.c.l.bf16 %v148_v0  ;;  %v150_v3 = vunpack.c.h.bf16 %v148_v0  ;;  %119 = vmatpush.bf16.msra.mxu0 %v146_v22  ;;  %v145_v24 = vld [vmem:[%s225_s3] sm:$0xff] }
   0x3   :  { %v152_v43 = vld [vmem:[%s222_s1] ss:$0 sm:$0xff] }
   0x4   :  { %v26_v2 = vsel %vm25_vm0, %v149_v1, 0.0  ;;  %v29_v4 = vsel %vm25_vm0, %v150_v3, 0.0  ;;  %v153_v48 = vld [vmem:[%s223_s2] ss:$0 sm:$0xff] }
   0x5   :  { %27 = vadd.xlane.f32.xlu0 %v26_v2  ;;  %v154_v53 = vld [vmem:[%s224_s4] ss:$0 sm:$0xff] }
   0x6   :  { %120 = vmatpush.bf16.msra.mxu0 %v145_v24 }
   0x7   :  { %v156_v6 = vpop.eup %155 }
   0x8   :  { %v33_v7 = vmul.f32 32.0, %v156_v6  ;;  %vm37_vm1 = vweird.f32 %v156_v6 }
   0xa   :  { %v34_v8 = vsub.f32 1.0, %v33_v7 }
   0xc   :  { %v35_v9 = vmul.f32 %v156_v6, %v34_v8 }
   0xd   :  { %30 = vadd.xlane.f32.xlu0 %v29_v4 }
   0xe   :  { %v36_v10 = vadd.f32 %v156_v6, %v35_v9 }
  0x10   :  { %v38_v11 = vsel %vm37_vm1, %v156_v6, %v36_v10 }
  0x78   :  { %v28_v12 = vpop.xlane.xlu0 %27 }
  0x79   :  { %v39_v13 = vmul.f32 %v38_v11, %v28_v12 }
  0x7b   :  { %v41_v14 = vsub.f32 %v149_v1, %v39_v13 }
  0x7d   :  { %v43_v15 = vmul.f32 %v41_v14, %v41_v14 }
  0x7f   :  { %v45_v16 = vsel %vm25_vm0, %v43_v15, 0.0 }
  0x80   :  { %46 = vadd.xlane.f32.xlu1 %v45_v16  ;;  %v31_v17 = vpop.xlane.xlu0 %30 }
  0x81   :  { %v40_v18 = vmul.f32 %v38_v11, %v31_v17 }
  0x83   :  { %v42_v19 = vsub.f32 %v150_v3, %v40_v18 }
  0x85   :  { %v44_v20 = vmul.f32 %v42_v19, %v42_v19 }
  0x87   :  { %v48_v21 = vsel %vm25_vm0, %v44_v20, 0.0 }
  0x88   :  { %49 = vadd.xlane.f32.xlu1 %v48_v21 }
  0xf3   :  { %v47_v23 = vpop.xlane.xlu1 %46 }
  0xf4   :  { %v51_v25 = vmul.f32 %v47_v23, %v38_v11 }
  0xf6   :  { %v53_v26 = vadd.f32 1e-05, %v51_v25 }
  0xf8   :  { %157 = vrsqrt.f32 %v53_v26  ;;  %vm61_vm3 = vweird.f32 %v53_v26 }
  0xfb   :  { %v50_v27 = vpop.xlane.xlu1 %49 }
  0xfc   :  { %v52_v28 = vmul.f32 %v50_v27, %v38_v11 }
  0xfe   :  { %v158_v29 = vpop.eup %157  ;;  %v54_v30 = vadd.f32 1e-05, %v52_v28 }
  0xff   :  { %v56_v31 = vmul.f32 %v158_v29, %v53_v26  ;;  %vm62_vm2 = vweird.f32 %v158_v29 }
 0x100   :  { %159 = vrsqrt.f32 %v54_v30  ;;  %vm63_vm4 = vmor %vm61_vm3, %vm62_vm2  ;;  %vm71_vm6 = vweird.f32 %v54_v30 }
 0x101   :  { %v57_v32 = vmul.f32 %v158_v29, %v56_v31 }
 0x103   :  { %v58_v33 = vmul.f32 0.5, %v57_v32 }
 0x105   :  { %v59_v34 = vsub.f32 1.5, %v58_v33 }
 0x106   :  { %v160_v35 = vpop.eup %159 }
 0x107   :  { %v60_v36 = vmul.f32 %v158_v29, %v59_v34  ;;  %v66_v37 = vmul.f32 %v160_v35, %v54_v30  ;;  %vm72_vm5 = vweird.f32 %v160_v35 }
 0x108   :  { %vm73_vm7 = vmor %vm71_vm6, %vm72_vm5 }
 0x109   :  { %v67_v38 = vmul.f32 %v160_v35, %v66_v37  ;;  %v64_v39 = vsel %vm63_vm4, %v158_v29, %v60_v36 }
 0x10a   :  { %v75_v42 = vmul.f32 %v64_v39, %v41_v14 }
 0x10b   :  { %v68_v40 = vmul.f32 0.5, %v67_v38 }
 0x10c   :  { %v81_v47 = vmul.f32 %v152_v43, %v75_v42 }
 0x10d   :  { %v69_v41 = vsub.f32 1.5, %v68_v40 }
 0x10e   :  { %v87_v50 = vadd.f32 %v153_v48, %v81_v47 }
 0x10f   :  { %v70_v44 = vmul.f32 %v160_v35, %v69_v41 }
 0x111   :  { %v74_v45 = vsel %vm73_vm7, %v160_v35, %v70_v44 }
 0x112   :  { %v76_v46 = vmul.f32 %v74_v45, %v42_v19 }
 0x114   :  { %v82_v49 = vmul.f32 %v152_v43, %v76_v46 }
 0x116   :  { %v88_v51 = vadd.f32 %v153_v48, %v82_v49 }
 0x118   :  { %v89_v52 = vpack.c.bf16 %v88_v51, %v87_v50 }
 0x11a   :  { %144 = vmatmul.msk.bf16.vlgmr.msra.gmra.mxu0 %vm25_vm0, %v89_v52 }
 0x197   :  { %v122_v54 = vpop.f32.mrf.mxu0 }
 0x198   :  { %v123_v55 = vadd.f32 %v154_v53, %v122_v54 }
 0x19a   :  { %v127_v56 = vpack.c.bf16 %v123_v55, %v123_v55 }
 0x19c   :  { %130 = vst.msk [vmem:[%s226_s5] sm:$0xf] %vm129_vm8, %v127_v56 }
 0x19f   :  { %v124_v57 = vpop.f32.mrf.mxu0 }
 0x1a0   :  { %v125_v58 = vadd.f32 %v154_v53, %v124_v57 }
 0x1a2   :  { %v128_v59 = vpack.c.bf16 %v125_v58, %v125_v58 }
 0x1a4   :  { %131 = vst.msk [vmem:[%s226_s5 + $0x4] sm:$0xf] %vm129_vm8, %v128_v59 }

// kernel: text_decoder_forward.22
= control target key start
LH: loop header
LB: loop body
LE: loop exit
PB: predicated region body
PF: predicated region fallthrough
CT: control target
= control target key end

     0   :  { %vm25_vm0 = vcmask 261120   ;;  %v161_v5 = vmov 32.0   ;;  %vm129_vm8 = vcmask 257024   ;;  %s221_s0 = inlined_call_operand.vmem [shape: bf16[16,32], index: 0, kind: input, shape index: {}]   ;;  %s222_s1 = inlined_call_operand.vmem [shape: f32[1,32], index: 1, kind: input, shape index: {}]   ;;  %s223_s2 = inlined_call_operand.vmem [shape: f32[1,32], index: 2, kind: input, shape index: {}]   ;;  %s224_s4 = inlined_call_operand.vmem [shape: f32[1,32], index: 4, kind: input, shape index: {}]   ;;  %s225_s3 = inlined_call_operand.vmem [shape: bf16[32,32], index: 3, kind: input, shape index: {}]   ;;  %s226_s5 = inlined_call_operand.vmem [shape: bf16[16,32], index: 5, kind: output, shape index: {}]  }
   0x1   :  { %v148_v0 = vld [vmem:[%s221_s0] sm:$0xff]   ;;  %155 = vrcp.f32 %v161_v5  ;;  %v146_v22 = vld [vmem:[%s225_s3 + $0x8] sm:$0xff] }
   0x2   :  { %v149_v1 = vunpack.c.l.bf16 %v148_v0  ;;  %v150_v3 = vunpack.c.h.bf16 %v148_v0  ;;  %119 = vmatpush.bf16.msra.mxu0 %v146_v22  ;;  %v145_v24 = vld [vmem:[%s225_s3] sm:$0xff] }
   0x3   :  { %v152_v43 = vld [vmem:[%s222_s1] ss:$0 sm:$0xff] }
   0x4   :  { %v26_v2 = vsel %vm25_vm0, %v149_v1, 0.0  ;;  %v29_v4 = vsel %vm25_vm0, %v150_v3, 0.0  ;;  %v153_v48 = vld [vmem:[%s223_s2] ss:$0 sm:$0xff] }
   0x5   :  { %27 = vadd.xlane.f32.xlu0 %v26_v2  ;;  %v154_v53 = vld [vmem:[%s224_s4] ss:$0 sm:$0xff] }
   0x6   :  { %120 = vmatpush.bf16.msra.mxu0 %v145_v24 }
   0x7   :  { %v156_v6 = vpop.eup %155 }
   0x8   :  { %v33_v7 = vmul.f32 32.0, %v156_v6  ;;  %vm37_vm1 = vweird.f32 %v156_v6 }
   0xa   :  { %v34_v8 = vsub.f32 1.0, %v33_v7 }
   0xc   :  { %v35_v9 = vmul.f32 %v156_v6, %v34_v8 }
   0xd   :  { %30 = vadd.xlane.f32.xlu0 %v29_v4 }
   0xe   :  { %v36_v10 = vadd.f32 %v156_v6, %v35_v9 }
  0x10   :  { %v38_v11 = vsel %vm37_vm1, %v156_v6, %v36_v10 }
  0x78   :  { %v28_v12 = vpop.xlane.xlu0 %27 }
  0x79   :  { %v39_v13 = vmul.f32 %v38_v11, %v28_v12 }
  0x7b   :  { %v41_v14 = vsub.f32 %v149_v1, %v39_v13 }
  0x7d   :  { %v43_v15 = vmul.f32 %v41_v14, %v41_v14 }
  0x7f   :  { %v45_v16 = vsel %vm25_vm0, %v43_v15, 0.0 }
  0x80   :  { %46 = vadd.xlane.f32.xlu1 %v45_v16  ;;  %v31_v17 = vpop.xlane.xlu0 %30 }
  0x81   :  { %v40_v18 = vmul.f32 %v38_v11, %v31_v17 }
  0x83   :  { %v42_v19 = vsub.f32 %v150_v3, %v40_v18 }
  0x85   :  { %v44_v20 = vmul.f32 %v42_v19, %v42_v19 }
  0x87   :  { %v48_v21 = vsel %vm25_vm0, %v44_v20, 0.0 }
  0x88   :  { %49 = vadd.xlane.f32.xlu1 %v48_v21 }
  0xf3   :  { %v47_v23 = vpop.xlane.xlu1 %46 }
  0xf4   :  { %v51_v25 = vmul.f32 %v47_v23, %v38_v11 }
  0xf6   :  { %v53_v26 = vadd.f32 1e-05, %v51_v25 }
  0xf8   :  { %157 = vrsqrt.f32 %v53_v26  ;;  %vm61_vm3 = vweird.f32 %v53_v26 }
  0xfb   :  { %v50_v27 = vpop.xlane.xlu1 %49 }
  0xfc   :  { %v52_v28 = vmul.f32 %v50_v27, %v38_v11 }
  0xfe   :  { %v158_v29 = vpop.eup %157  ;;  %v54_v30 = vadd.f32 1e-05, %v52_v28 }
  0xff   :  { %v56_v31 = vmul.f32 %v158_v29, %v53_v26  ;;  %vm62_vm2 = vweird.f32 %v158_v29 }
 0x100   :  { %159 = vrsqrt.f32 %v54_v30  ;;  %vm63_vm4 = vmor %vm61_vm3, %vm62_vm2  ;;  %vm71_vm6 = vweird.f32 %v54_v30 }
 0x101   :  { %v57_v32 = vmul.f32 %v158_v29, %v56_v31 }
 0x103   :  { %v58_v33 = vmul.f32 0.5, %v57_v32 }
 0x105   :  { %v59_v34 = vsub.f32 1.5, %v58_v33 }
 0x106   :  { %v160_v35 = vpop.eup %159 }
 0x107   :  { %v60_v36 = vmul.f32 %v158_v29, %v59_v34  ;;  %v66_v37 = vmul.f32 %v160_v35, %v54_v30  ;;  %vm72_vm5 = vweird.f32 %v160_v35 }
 0x108   :  { %vm73_vm7 = vmor %vm71_vm6, %vm72_vm5 }
 0x109   :  { %v67_v38 = vmul.f32 %v160_v35, %v66_v37  ;;  %v64_v39 = vsel %vm63_vm4, %v158_v29, %v60_v36 }
 0x10a   :  { %v75_v42 = vmul.f32 %v64_v39, %v41_v14 }
 0x10b   :  { %v68_v40 = vmul.f32 0.5, %v67_v38 }
 0x10c   :  { %v81_v47 = vmul.f32 %v152_v43, %v75_v42 }
 0x10d   :  { %v69_v41 = vsub.f32 1.5, %v68_v40 }
 0x10e   :  { %v87_v50 = vadd.f32 %v153_v48, %v81_v47 }
 0x10f   :  { %v70_v44 = vmul.f32 %v160_v35, %v69_v41 }
 0x111   :  { %v74_v45 = vsel %vm73_vm7, %v160_v35, %v70_v44 }
 0x112   :  { %v76_v46 = vmul.f32 %v74_v45, %v42_v19 }
 0x114   :  { %v82_v49 = vmul.f32 %v152_v43, %v76_v46 }
 0x116   :  { %v88_v51 = vadd.f32 %v153_v48, %v82_v49 }
 0x118   :  { %v89_v52 = vpack.c.bf16 %v88_v51, %v87_v50 }
 0x11a   :  { %144 = vmatmul.msk.bf16.vlgmr.msra.gmra.mxu0 %vm25_vm0, %v89_v52 }
 0x197   :  { %v122_v54 = vpop.f32.mrf.mxu0 }
 0x198   :  { %v123_v55 = vadd.f32 %v154_v53, %v122_v54 }
 0x19a   :  { %v127_v56 = vpack.c.bf16 %v123_v55, %v123_v55 }
 0x19c   :  { %130 = vst.msk [vmem:[%s226_s5] sm:$0xf] %vm129_vm8, %v127_v56 }
 0x19f   :  { %v124_v57 = vpop.f32.mrf.mxu0 }
 0x1a0   :  { %v125_v58 = vadd.f32 %v154_v53, %v124_v57 }
 0x1a2   :  { %v128_v59 = vpack.c.bf16 %v125_v58, %v125_v58 }
 0x1a4   :  { %131 = vst.msk [vmem:[%s226_s5 + $0x4] sm:$0xf] %vm129_vm8, %v128_v59 }

// kernel: text_decoder_forward.21
= control target key start
LH: loop header
LB: loop body
LE: loop exit
PB: predicated region body
PF: predicated region fallthrough
CT: control target
= control target key end

     0   :  { %vm22_vm0 = vcmask 261120   ;;  %v120_v1 = vmov 0.0   ;;  %vm91_vm1 = vcmask 257024   ;;  %s172_s1 = inlined_call_operand.vmem [shape: bf16[32,32], index: 1, kind: input, shape index: {}]   ;;  %s173_s2 = inlined_call_operand.vmem [shape: f32[1,32], index: 2, kind: input, shape index: {}]   ;;  %s174_s0 = inlined_call_operand.vmem [shape: bf16[16,32], index: 0, kind: input, shape index: {}]   ;;  %s175_s3 = inlined_call_operand.vmem [shape: bf16[16,32], index: 3, kind: input, shape index: {}]   ;;  %s176_s4 = inlined_call_operand.vmem [shape: bf16[16,32], index: 4, kind: output, shape index: {}]  }
   0x1   :  { %v113_v0 = vld [vmem:[%s172_s1 + $0x8] sm:$0xff]  ;;  %23 = vst.msk [vmem:[#allocation2] sm:$0xff] %vm22_vm0, %v120_v1  ;;  %v112_v2 = vld [vmem:[%s172_s1] sm:$0xff] }
   0x2   :  { %24 = vst.msk [vmem:[#allocation2 + $0x8] sm:$0xff] %vm22_vm0, %v120_v1  ;;  %60 = vmatpush.bf16.msra.mxu0 %v113_v0  ;;  %v111_v3 = vld [vmem:[%s174_s0] sm:$0xff] }
   0x3   :  { %v115_v7 = vld [vmem:[%s175_s3] sm:$0xff]  }
   0x4   :  { %v119_v9 = vld [vmem:[%s173_s2] ss:$0 sm:$0xff]  ;;  %v116_v11 = vunpack.c.l.bf16 %v115_v7  ;;  %v117_v17 = vunpack.c.h.bf16 %v115_v7 }
   0x6   :  { %61 = vmatpush.bf16.msra.mxu0 %v112_v2 }
   0x8   :  { %v25_v4 = vld [vmem:[#allocation2] sm:$0xff] }
   0x9   :  { %110 = vmatmul.msk.bf16.vlgmr.msra.gmra.mxu0 %vm22_vm0, %v111_v3  ;;  %v26_v8 = vld [vmem:[#allocation2 + $0x8] sm:$0xff] }
  0x86   :  { %v63_v5 = vpop.f32.mrf.mxu0 }
  0x87   :  { %v68_v6 = vadd.f32 %v63_v5, %v25_v4 }
  0x89   :  { %70 = vst.msk [vmem:[#allocation2] sm:$0xff] %vm22_vm0, %v68_v6 }
  0x8e   :  { %v65_v10 = vpop.f32.mrf.mxu0 }
  0x8f   :  { %v69_v12 = vadd.f32 %v65_v10, %v26_v8 }
  0x90   :  { %v75_v13 = vld [vmem:[#allocation2] sm:$0xff] }
  0x91   :  { %v81_v14 = vadd.f32 %v119_v9, %v75_v13  ;;  %71 = vst.msk [vmem:[#allocation2 + $0x8] sm:$0xff] %vm22_vm0, %v69_v12 }
  0x93   :  { %v87_v15 = vadd.f32 %v116_v11, %v81_v14 }
  0x95   :  { %v89_v16 = vpack.c.bf16 %v87_v15, %v87_v15 }
  0x97   :  { %92 = vst.msk [vmem:[%s176_s4] sm:$0xf] %vm91_vm1, %v89_v16 }
  0x98   :  { %v76_v18 = vld [vmem:[#allocation2 + $0x8] sm:$0xff] }
  0x99   :  { %v82_v19 = vadd.f32 %v119_v9, %v76_v18 }
  0x9b   :  { %v88_v20 = vadd.f32 %v117_v17, %v82_v19 }
  0x9d   :  { %v90_v21 = vpack.c.bf16 %v88_v20, %v88_v20 }
  0x9f   :  { %93 = vst.msk [vmem:[%s176_s4 + $0x4] sm:$0xf] %vm91_vm1, %v90_v21 }

// kernel: text_decoder_forward.20
= control target key start
LH: loop header
LB: loop body
LE: loop exit
PB: predicated region body
PF: predicated region fallthrough
CT: control target
= control target key end

     0   :  { %s919_s12 = smov 0   ;;  %s921_s13 = smov 0   ;;  %s1065_s0 = inlined_call_operand.vmem [shape: bf16[8,8,8], index: 0, kind: input, shape index: {}]   ;;  %s1066_s1 = inlined_call_operand.vmem [shape: bf16[8,8,8], index: 1, kind: input, shape index: {}]   ;;  %s1067_s2 = inlined_call_operand.vmem [shape: bf16[8,8,8], index: 2, kind: input, shape index: {}]   ;;  %s1068_s3 = inlined_call_operand.vmem [shape: bf16[8,8,8], index: 3, kind: output, shape index: {}]  }
   0x1   :  { %s923_s14 = smov 0  }
   0x2 LB: > { %s32_s15 = sadd.s32 1, %s890_s13  ;;  %p790_p0 = scmp.ge.s32.totalorder %s894_s14, 1  ;;  %s894_s14 = sphi %s923_s14, %s13_s14   ;;  %s890_s13 = sphi %s921_s13, %s1070_s13   ;;  %s886_s12 = sphi %s919_s12, %s1069_s12  }
   0x3   : > { %p34_p1 = scmp.ge.s32.totalorder %s32_s15, 2  ;;  %p196_p2 = scmp.lt.s32.totalorder %s894_s14, 3 }
   0x5   : > { %s1072_s15 = smov (%p34_p1, %s32_s15), 0  ;;  %p197_p3 = pnand %p790_p0, %p196_p2 }
   0x6   : > { %s791_s16 = sshll.u32 (!%p197_p3), %s886_s12, 2 }
   0x7   : > { %200 = sbr.rel (%p197_p3) target bundleno = 699 (0x2bb), region = 32  ;;  %p243_p4 = scmp.lt.s32.totalorder (!%p197_p3), %s791_s16, 7 }
   0xc   : > { %s1074_s16 = smov (!%p243_p4, %s791_s16), 7  ;;  %vm292_vm0 = vcmask 64512   ;;  %vm283_vm1 = vcmask 7168   ;;  %v896_v22 = vmov -inf   ;;  %v394_v23 = vlaneseq }
   0xd   : > { %s937_s17 = sshll.u32 %s1074_s16, 2  ;;  %284 = vst.msk [vmem:[#allocation2] sm:$0xff] %vm283_vm1, %v896_v22  ;;  %v897_v42 = vmov 0   ;;  %v898_v43 = vmov 0.0   ;;  %vm541_vm3 = vcmask 1043456   ;;  %vm670_vm4 = vcmask 60416  }
   0xe   : > { %s258_s20 = scalar_lea.vmem %s1066_s1, %s937_s17  ;;  %s249_s23 = scalar_lea.vmem %s1065_s0, %s937_s17  ;;  %285 = vst.msk [vmem:[#allocation2 + $0x8] sm:$0xff] %vm283_vm1, %v896_v22  ;;  %v395_v24 = vshrl.u32 %v394_v23, 7  ;;  %v400_v25 = vand.u32 127, %v394_v23  ;;  %846 = vset.pattern.permute.xlu0 %v897_v42  ;;  %845 = vset.pattern.permute.xlu2 %v897_v42 }
   0xf   : > { %v313_v0 = vld [vmem:[%s258_s20] sm:$0xf]  ;;  %v315_v1 = vld [vmem:[%s258_s20 + $0x8] sm:$0xf]  ;;  %v314_v7 = vld [vmem:[%s258_s20 + $0x4] sm:$0xf]  ;;  %847 = vset.pattern.permute.xlu1 %v897_v42  ;;  %s267_s26 = scalar_lea.vmem %s1067_s2, %s937_s17  ;;  %s276_s29 = scalar_lea.vmem %s1068_s3, %s937_s17 }
  0x10   : > { %v810_v2 = vld [vmem:[%s249_s23] sm:$0xff]   ;;  %v322_v3 = vsel %vm292_vm0, %v313_v0, 0  ;;  %v360_v4 = vsel %vm292_vm0, %v315_v1, 0  ;;  %v817_v6 = vld [vmem:[%s249_s23 + $0x8] sm:$0xff]   ;;  %v341_v10 = vsel %vm292_vm0, %v314_v7, 0  ;;  %286 = vst.msk [vmem:[#allocation2 + $0x10] sm:$0xff] %vm283_vm1, %v896_v22  ;;  %vm404_vm2 = vcmp.le.s32.totalorder %v400_v25, %v395_v24 }
  0x11   : > { %v811_v5 = vunpack.c.l.bf16 %v810_v2  ;;  %v812_v8 = vunpack.c.h.bf16 %v810_v2  ;;  %331 = vmatpush.bf16.xpose.msra.mxu0 %v322_v3  ;;  %369 = vmatpush.bf16.xpose.msra.mxu2 %v360_v4  ;;  %v815_v9 = vunpack.c.l.bf16 %v817_v6  ;;  %v316_v11 = vld [vmem:[%s258_s20 + $0xc] sm:$0xf]  ;;  %v816_v12 = vunpack.c.h.bf16 %v817_v6  ;;  %287 = vst.msk [vmem:[#allocation2 + $0x18] sm:$0xff] %vm283_vm1, %v896_v22  ;;  %v536_v60 = vld [vmem:[%s267_s26 + $0x8] sm:$0xf] }
  0x12   : > { %350 = vmatpush.bf16.xpose.msra.mxu1 %v341_v10  ;;  %v379_v14 = vsel %vm292_vm0, %v316_v11, 0  ;;  %290 = vst.msk [vmem:[#allocation3 + $0x10] sm:$0xff] %vm283_vm1, %v898_v43  ;;  %v581_v61 = vsel %vm541_vm3, %v536_v60, 0  ;;  %v537_v62 = vld [vmem:[%s267_s26 + $0xc] sm:$0xf] }
  0x13   : > { %v305_v13 = vmul.f32 0.35355338, %v811_v5  ;;  %v306_v15 = vmul.f32 0.35355338, %v812_v8  ;;  %v307_v16 = vmul.f32 0.35355338, %v815_v9  ;;  %388 = vmatpush.bf16.xpose.msra.mxu3 %v379_v14 }
  0x14   : > { %v308_v17 = vmul.f32 0.35355338, %v816_v12  ;;  %288 = vst.msk [vmem:[#allocation3] sm:$0xff] %vm283_vm1, %v898_v43  ;;  %v987_v44 = vld [vmem:[#allocation2] sm:$0xff]  ;;  %v600_v63 = vsel %vm541_vm3, %v537_v62, 0 }
  0x15   : > { %v309_v18 = vpack.c.bf16 %v305_v13, %v305_v13  ;;  %v311_v19 = vpack.c.bf16 %v307_v16, %v307_v16  ;;  %v310_v20 = vpack.c.bf16 %v306_v15, %v306_v15  ;;  %289 = vst.msk [vmem:[#allocation3 + $0x8] sm:$0xff] %vm283_vm1, %v898_v43  ;;  %v999_v50 = vld [vmem:[#allocation2 + $0x8] sm:$0xff]  ;;  %v534_v0 = vld [vmem:[%s267_s26] sm:$0xf]  ;;  %v535_v3 = vld [vmem:[%s267_s26 + $0x4] sm:$0xf] }
  0x16   : > { %v312_v21 = vpack.c.bf16 %v308_v17, %v308_v17  ;;  %291 = vst.msk [vmem:[#allocation3 + $0x18] sm:$0xff] %vm283_vm1, %v898_v43  ;;  %v543_v1 = vsel %vm541_vm3, %v534_v0, 0  ;;  %v562_v5 = vsel %vm541_vm3, %v535_v3, 0 }
  0x17   : > { %293 = vst.msk [vmem:[#allocation4] sm:$0xff] %vm292_vm0, %v898_v43  ;;  %v997_v48 = vld [vmem:[#allocation2 + $0x10] sm:$0xff] }
  0x18   : > { %799 = vmatmul.msk.bf16.vlgmr.msra.gmra.mxu0 %vm292_vm0, %v309_v18  ;;  %801 = vmatmul.msk.bf16.vlgmr.msra.gmra.mxu2 %vm292_vm0, %v311_v19  ;;  %294 = vst.msk [vmem:[#allocation4 + $0x8] sm:$0xff] %vm292_vm0, %v898_v43  ;;  %v1012_v56 = vld [vmem:[#allocation2 + $0x18] sm:$0xff] }
  0x19   : > { %800 = vmatmul.msk.bf16.vlgmr.msra.gmra.mxu1 %vm292_vm0, %v310_v20  ;;  %295 = vst.msk [vmem:[#allocation4 + $0x10] sm:$0xff] %vm292_vm0, %v898_v43  ;;  %590 = vmatpush.bf16.msrb.mxu2 %v581_v61 }
  0x1a   : > { %802 = vmatmul.msk.bf16.vlgmr.msra.gmra.mxu3 %vm292_vm0, %v312_v21  ;;  %296 = vst.msk [vmem:[#allocation4 + $0x18] sm:$0xff] %vm292_vm0, %v898_v43  ;;  %552 = vmatpush.bf16.msrb.mxu0 %v543_v1 }
  0x1b   : > { %609 = vmatpush.bf16.msrb.mxu3 %v600_v63  ;;  %571 = vmatpush.bf16.msrb.mxu1 %v562_v5 }
  0x95   : > { %v333_v26 = vpop.f32.mrf.mxu0 }
  0x96   : > { %v960_v27 = vsel %vm404_vm2, %v333_v26, -1e+30  ;;  %v352_v28 = vpop.f32.mrf.mxu1 }
  0x97   : > { %v413_v29 = vsel %vm292_vm0, %v960_v27, -inf  ;;  %v965_v30 = vsel %vm404_vm2, %v352_v28, -1e+30 }
  0x98   : > { %414 = vmax.xlane.f32.xlu1 %v413_v29  ;;  %v416_v35 = vsel %vm292_vm0, %v965_v30, -inf }
  0x9b   : > { %v371_v31 = vpop.f32.mrf.mxu2 }
  0x9c   : > { %v968_v32 = vsel %vm404_vm2, %v371_v31, -1e+30 }
  0x9d   : > { %v335_v33 = vpop.f32.mrf.mxu0  ;;  %v419_v34 = vsel %vm292_vm0, %v968_v32, -inf  ;;  %v390_v36 = vpop.f32.mrf.mxu3 }
  0x9e   : > { %420 = vmax.xlane.f32.xlu0 %v419_v34  ;;  %v354_v37 = vpop.f32.mrf.mxu1  ;;  %v975_v38 = vsel %vm404_vm2, %v390_v36, -1e+30 }
  0x9f   : > { %v422_v39 = vsel %vm292_vm0, %v975_v38, -inf }
  0xa0   : > { %417 = vmax.xlane.f32.xlu1 %v416_v35  ;;  %v475_v35 = vld [vmem:[#allocation3 + $0x10] sm:$0xff] }
  0xa3   : > { %v373_v40 = vpop.f32.mrf.mxu2 }
  0xa5   : > { %v392_v41 = vpop.f32.mrf.mxu3 }
  0xa6   : > { %423 = vmax.xlane.f32.xlu0 %v422_v39  ;;  %v473_v41 = vld [vmem:[#allocation3] sm:$0xff] }
 0x10b   : > { %v415_v45 = vpop.xlane.xlu1 %414 }
 0x10c   : > { %v990_v46 = vmax.f32 %v987_v44, %v415_v45 }
 0x10e   : > { %v429_v47 = vsub.f32 %v987_v44, %v990_v46  ;;  %623 = vst.msk [vmem:[#allocation2] sm:$0xff] %vm283_vm1, %v990_v46  ;;  %443 = vperm.xlu0 %846, %v990_v46  }
 0x111   : > { %v421_v49 = vpop.xlane.xlu0 %420 }
 0x112   : > { %v1002_v51 = vmax.f32 %v997_v48, %v421_v49 }
 0x113   : > { %v418_v52 = vpop.xlane.xlu1 %417 }
 0x114   : > { %v431_v53 = vsub.f32 %v997_v48, %v1002_v51  ;;  %625 = vst.msk [vmem:[#allocation2 + $0x10] sm:$0xff] %vm283_vm1, %v1002_v51  ;;  %v426_v54 = vmax.f32 %v999_v50, %v418_v52  ;;  %453 = vperm.xlu2 %845, %v1002_v51   ;;  %v502_v48 = vld [vmem:[#allocation4] sm:$0xff] }
 0x116   : > { %v430_v55 = vsub.f32 %v999_v50, %v426_v54  ;;  %624 = vst.msk [vmem:[#allocation2 + $0x8] sm:$0xff] %vm283_vm1, %v426_v54  ;;  %448 = vperm.xlu1 %847, %v426_v54   ;;  %v437_v28 = vmul.f32 1.442695, %v431_v53 }
 0x118   : > { %v435_v29 = vmul.f32 1.442695, %v430_v55 }
 0x119   : > { %v424_v57 = vpop.xlane.xlu0 %423 }
 0x11a   : > { %v1015_v58 = vmax.f32 %v1012_v56, %v424_v57 }
 0x11c   : > { %v432_v59 = vsub.f32 %v1012_v56, %v1015_v58  ;;  %626 = vst.msk [vmem:[#allocation2 + $0x18] sm:$0xff] %vm283_vm1, %v1015_v58  ;;  %458 = vperm.xlu2 %845, %v1015_v58  }
 0x11e   : > { %v439_v34 = vmul.f32 1.442695, %v432_v59  ;;  %v504_v59 = vld [vmem:[#allocation4 + $0x10] sm:$0xff] }
 0x16e   : > { %v454_v2 = vpop.permute.xlu2 %453 }
 0x16f   : > { %v463_v4 = vsub.f32 %v968_v32, %v454_v2 }
 0x171   : > { %v469_v6 = vmul.f32 1.442695, %v463_v4 }
 0x173   : > { %848 = vpow2.f32 %v469_v6  ;;  %v503_v6 = vld [vmem:[#allocation4 + $0x8] sm:$0xff] }
 0x176   : > { %v459_v7 = vpop.permute.xlu2 %458 }
 0x177   : > { %v464_v8 = vsub.f32 %v975_v38, %v459_v7 }
 0x179   : > { %v849_v9 = vpop.eup %848  ;;  %v471_v10 = vmul.f32 1.442695, %v464_v8 }
 0x17a   : > { %v487_v11 = vsel %vm292_vm0, %v849_v9, 0.0  ;;  %v532_v12 = vpack.c.bf16 %v849_v9, %v849_v9 }
 0x17b   : > { %850 = vpow2.f32 %v471_v10  ;;  %488 = vadd.xlane.f32.xlu0 %v487_v11  ;;  %v476_v10 = vld [vmem:[#allocation3 + $0x18] sm:$0xff] }
 0x17c   : > { %805 = vmatmul.msk.bf16.vlgmr.msrb.gmra.mxu2 %vm292_vm0, %v532_v12 }
 0x180   : > { %v444_v13 = vpop.permute.xlu0 %443 }
 0x181   : > { %v851_v14 = vpop.eup %850  ;;  %v461_v15 = vsub.f32 %v960_v27, %v444_v13  ;;  %v433_v27 = vmul.f32 1.442695, %v429_v47  ;;  %v474_v47 = vld [vmem:[#allocation3 + $0x8] sm:$0xff] }
 0x182   : > { %v533_v16 = vpack.c.bf16 %v851_v14, %v851_v14  ;;  %v490_v33 = vsel %vm292_vm0, %v851_v14, 0.0  ;;  %v505_v14 = vld [vmem:[#allocation4 + $0x18] sm:$0xff] }
 0x183   : > { %v465_v17 = vmul.f32 1.442695, %v461_v15 }
 0x184   : > { %806 = vmatmul.msk.bf16.vlgmr.msrb.gmra.mxu3 %vm292_vm0, %v533_v16 }
 0x185   : > { %852 = vpow2.f32 %v465_v17 }
 0x188   : > { %v449_v18 = vpop.permute.xlu1 %448 }
 0x189   : > { %v462_v19 = vsub.f32 %v965_v30, %v449_v18 }
 0x18b   : > { %v853_v20 = vpop.eup %852  ;;  %v467_v21 = vmul.f32 1.442695, %v462_v19 }
 0x18c   : > { %v481_v22 = vsel %vm292_vm0, %v853_v20, 0.0  ;;  %v530_v23 = vpack.c.bf16 %v853_v20, %v853_v20 }
 0x18d   : > { %854 = vpow2.f32 %v467_v21  ;;  %482 = vadd.xlane.f32.xlu2 %v481_v22 }
 0x18e   : > { %803 = vmatmul.msk.bf16.vlgmr.msrb.gmra.mxu0 %vm292_vm0, %v530_v23  ;;  %856 = vpow2.f32 %v433_v27 }
 0x18f   : > { %858 = vpow2.f32 %v437_v28 }
 0x190   : > { %860 = vpow2.f32 %v435_v29 }
 0x191   : > { %862 = vpow2.f32 %v439_v34 }
 0x193   : > { %v855_v24 = vpop.eup %854 }
 0x194   : > { %v484_v25 = vsel %vm292_vm0, %v855_v24, 0.0  ;;  %v531_v26 = vpack.c.bf16 %v855_v24, %v855_v24  ;;  %v857_v30 = vpop.eup %856 }
 0x195   : > { %485 = vadd.xlane.f32.xlu1 %v484_v25  ;;  %v859_v31 = vpop.eup %858  ;;  %v477_v44 = vmul.f32 %v857_v30, %v473_v41 }
 0x196   : > { %804 = vmatmul.msk.bf16.vlgmr.msrb.gmra.mxu1 %vm292_vm0, %v531_v26  ;;  %v861_v32 = vpop.eup %860  ;;  %v479_v37 = vmul.f32 %v859_v31, %v475_v35 }
 0x197   : > { %v863_v36 = vpop.eup %862  ;;  %v478_v51 = vmul.f32 %v861_v32, %v474_v47 }
 0x198   : > { %v480_v11 = vmul.f32 %v863_v36, %v476_v10 }
 0x1a5   : > { %508 = vperm.xlu2 %845, %v857_v30  }
 0x1ad   : > { %518 = vperm.xlu2 %845, %v859_v31  }
 0x1ae   : > { %513 = vperm.xlu1 %847, %v861_v32  }
 0x1d6   : > { %491 = vadd.xlane.f32.xlu2 %v490_v33 }
 0x1ee   : > { %v489_v38 = vpop.xlane.xlu0 %488  ;;  %523 = vperm.xlu2 %845, %v863_v36  }
 0x1ef   : > { %v495_v39 = vadd.f32 %v489_v38, %v479_v37 }
 0x1f1   : > { %500 = vst.msk [vmem:[#allocation3 + $0x10] sm:$0xff] %vm283_vm1, %v495_v39 }
 0x1f8   : > { %v632_v40 = vld [vmem:[#allocation3 + $0x10] sm:$0xff] }
 0x1f9   : > { %864 = vrcp.f32 %v632_v40 }
 0x1ff   : > { %v865_v42 = vpop.eup %864  ;;  %v592_v43 = vpop.f32.mrf.mxu2 }
 0x200   : > { %v483_v45 = vpop.xlane.xlu2 %482  ;;  %654 = vperm.xlu1 %847, %v865_v42  }
 0x201   : > { %v493_v46 = vadd.f32 %v483_v45, %v477_v44 }
 0x203   : > { %498 = vst.msk [vmem:[#allocation3] sm:$0xff] %vm283_vm1, %v493_v46 }
 0x207   : > { %v594_v49 = vpop.f32.mrf.mxu2  ;;  %v611_v50 = vpop.f32.mrf.mxu3 }
 0x208   : > { %v509_v52 = vpop.permute.xlu2 %508  ;;  %v486_v53 = vpop.xlane.xlu1 %485 }
 0x209   : > { %v526_v54 = vmul.f32 %v509_v52, %v502_v48  ;;  %v494_v55 = vadd.f32 %v486_v53, %v478_v51 }
 0x20a   : > { %v630_v56 = vld [vmem:[#allocation3] sm:$0xff] }
 0x20b   : > { %499 = vst.msk [vmem:[#allocation3 + $0x8] sm:$0xff] %vm283_vm1, %v494_v55  ;;  %v554_v57 = vpop.f32.mrf.mxu0  ;;  %866 = vrcp.f32 %v630_v56 }
 0x20c   : > { %v615_v58 = vadd.f32 %v554_v57, %v526_v54 }
 0x20e   : > { %619 = vst.msk [vmem:[#allocation4] sm:$0xff] %vm292_vm0, %v615_v58 }
 0x20f   : > { %v613_v60 = vpop.f32.mrf.mxu3 }
 0x210   : > { %v519_v61 = vpop.permute.xlu2 %518 }
 0x211   : > { %v867_v62 = vpop.eup %866  ;;  %v528_v63 = vmul.f32 %v519_v61, %v504_v59 }
 0x212   : > { %644 = vperm.xlu0 %846, %v867_v62   ;;  %v631_v0 = vld [vmem:[#allocation3 + $0x8] sm:$0xff] }
 0x213   : > { %v617_v1 = vadd.f32 %v592_v43, %v528_v63  ;;  %v556_v2 = vpop.f32.mrf.mxu0  ;;  %v573_v3 = vpop.f32.mrf.mxu1  ;;  %868 = vrcp.f32 %v631_v0 }
 0x215   : > { %621 = vst.msk [vmem:[#allocation4 + $0x10] sm:$0xff] %vm292_vm0, %v617_v1  ;;  %v638_v26 = vld [vmem:[#allocation4] sm:$0xff] }
 0x219   : > { %v869_v4 = vpop.eup %868 }
 0x21a   : > { %649 = vperm.xlu2 %845, %v869_v4  }
 0x21b   : > { %v575_v5 = vpop.f32.mrf.mxu1 }
 0x21c   : > { %v640_v23 = vld [vmem:[#allocation4 + $0x10] sm:$0xff] }
 0x220   : > { %v514_v7 = vpop.permute.xlu1 %513 }
 0x221   : > { %v527_v8 = vmul.f32 %v514_v7, %v503_v6 }
 0x223   : > { %v616_v9 = vadd.f32 %v573_v3, %v527_v8 }
 0x225   : > { %620 = vst.msk [vmem:[#allocation4 + $0x8] sm:$0xff] %vm292_vm0, %v616_v9 }
 0x22c   : > { %v639_v22 = vld [vmem:[#allocation4 + $0x8] sm:$0xff] }
 0x249   : > { %v492_v12 = vpop.xlane.xlu2 %491 }
 0x24a   : > { %v496_v13 = vadd.f32 %v492_v12, %v480_v11 }
 0x24c   : > { %501 = vst.msk [vmem:[#allocation3 + $0x18] sm:$0xff] %vm283_vm1, %v496_v13 }
 0x251   : > { %v524_v15 = vpop.permute.xlu2 %523 }
 0x252   : > { %v529_v16 = vmul.f32 %v524_v15, %v505_v14 }
 0x253   : > { %v633_v17 = vld [vmem:[#allocation3 + $0x18] sm:$0xff] }
 0x254   : > { %v618_v18 = vadd.f32 %v611_v50, %v529_v16  ;;  %870 = vrcp.f32 %v633_v17 }
 0x256   : > { %622 = vst.msk [vmem:[#allocation4 + $0x18] sm:$0xff] %vm292_vm0, %v618_v18 }
 0x25a   : > { %v871_v19 = vpop.eup %870 }
 0x25b   : > { %659 = vperm.xlu2 %845, %v871_v19  }
 0x25d   : > { %v641_v32 = vld [vmem:[#allocation4 + $0x18] sm:$0xff] }
 0x272   : > { %v655_v21 = vpop.permute.xlu1 %654 }
 0x273   : > { %v664_v27 = vmul.f32 %v655_v21, %v640_v23 }
 0x274   : > { %v650_v20 = vpop.permute.xlu2 %649 }
 0x275   : > { %v663_v24 = vmul.f32 %v650_v20, %v639_v22  ;;  %v668_v31 = vpack.c.bf16 %v664_v27, %v664_v27 }
 0x277   : > { %v667_v30 = vpack.c.bf16 %v663_v24, %v663_v24  ;;  %673 = vst.msk [vmem:[%s276_s29 + $0x8] sm:$0xf] %vm670_vm4, %v668_v31 }
 0x279   : > { %672 = vst.msk [vmem:[%s276_s29 + $0x4] sm:$0xf] %vm670_vm4, %v667_v30 }
 0x284   : > { %v645_v25 = vpop.permute.xlu0 %644 }
 0x285   : > { %v662_v28 = vmul.f32 %v645_v25, %v638_v26 }
 0x287   : > { %v666_v29 = vpack.c.bf16 %v662_v28, %v662_v28 }
 0x289   : > { %671 = vst.msk [vmem:[%s276_s29] sm:$0xf] %vm670_vm4, %v666_v29 }
 0x2b5   : > { %v660_v33 = vpop.permute.xlu2 %659 }
 0x2b6   : > { %v665_v34 = vmul.f32 %v660_v33, %v641_v32 }
 0x2b8   : > { %v669_v35 = vpack.c.bf16 %v665_v34, %v665_v34 }
 0x2ba   : > { %674 = vst.msk [vmem:[%s276_s29 + $0xc] sm:$0xf] %vm670_vm4, %v669_v35 }
 0x2bb PF: > { %s13_s14 = sadd.s32 1, %s894_s14   ;;  %s1069_s12 = smov %s890_s13 }
 0x2bc   : > { %p10_p5 = scmp.ge.s32.totalorder %s13_s14, 4   ;;  %s1070_s13 = smov %s1072_s15 }
 0x2be   :  { %12 = sbr.rel (!%p10_p5) target bundleno = 2 (0x2), region = 76 }

// kernel: text_decoder_forward.23
= control target key start
LH: loop header
LB: loop body
LE: loop exit
PB: predicated region body
PF: predicated region fallthrough
CT: control target
= control target key end

     0   :  { %vm19_vm0 = vcmask 523264   ;;  %v147_v1 = vmov 0.0   ;;  %vm58_vm1 = vcmask 261120   ;;  %vm112_vm2 = vcmask 519168   ;;  %s203_s1 = inlined_call_operand.vmem [shape: bf16[32,64], index: 1, kind: input, shape index: {}]   ;;  %s204_s2 = inlined_call_operand.vmem [shape: f32[1,64], index: 2, kind: input, shape index: {}]   ;;  %s205_s0 = inlined_call_operand.vmem [shape: bf16[32,32], index: 0, kind: input, shape index: {}]   ;;  %s206_s3 = inlined_call_operand.vmem [shape: bf16[32,64], index: 3, kind: output, shape index: {}]  }
   0x1   :  { %v142_v0 = vld [vmem:[%s203_s1 + $0x8] sm:$0xff]  ;;  %20 = vst.msk [vmem:[#allocation2] sm:$0xff] %vm19_vm0, %v147_v1  ;;  %v141_v2 = vld [vmem:[%s203_s1] sm:$0xff] }
   0x2   :  { %21 = vst.msk [vmem:[#allocation2 + $0x8] sm:$0xff] %vm19_vm0, %v147_v1  ;;  %71 = vmatpush.bf16.msra.mxu0 %v142_v0  ;;  %143 = vmatpush.bf16.msra.mxu1 %v142_v0  ;;  %v139_v3 = vld [vmem:[%s205_s0] sm:$0xff]  ;;  %v140_v4 = vld [vmem:[%s205_s0 + $0x8] sm:$0xff] }
   0x3   :  { %22 = vst.msk [vmem:[#allocation2 + $0x10] sm:$0xff] %vm19_vm0, %v147_v1  ;;  %v146_v13 = vld [vmem:[%s204_s2] ss:$0 sm:$0xff] }
   0x4   :  { %23 = vst.msk [vmem:[#allocation2 + $0x18] sm:$0xff] %vm19_vm0, %v147_v1 }
   0x6   :  { %72 = vmatpush.bf16.msra.mxu0 %v141_v2  ;;  %144 = vmatpush.bf16.msra.mxu1 %v141_v2 }
   0x8   :  { %v24_v5 = vld [vmem:[#allocation2] sm:$0xff] }
   0x9   :  { %137 = vmatmul.msk.bf16.vlgmr.msra.gmra.mxu0 %vm58_vm1, %v139_v3  ;;  %138 = vmatmul.msk.bf16.vlgmr.msra.gmra.mxu1 %vm58_vm1, %v140_v4  ;;  %v25_v11 = vld [vmem:[#allocation2 + $0x8] sm:$0xff] }
   0xa   :  { %v26_v6 = vld [vmem:[#allocation2 + $0x10] sm:$0xff] }
   0xb   :  { %v27_v12 = vld [vmem:[#allocation2 + $0x18] sm:$0xff] }
  0x86   :  { %v74_v7 = vpop.f32.mrf.mxu0  ;;  %v79_v8 = vpop.f32.mrf.mxu1 }
  0x87   :  { %v84_v9 = vadd.f32 %v74_v7, %v24_v5  ;;  %v86_v10 = vadd.f32 %v79_v8, %v26_v6 }
  0x89   :  { %89 = vst.msk [vmem:[#allocation2] sm:$0xff] %vm19_vm0, %v84_v9 }
  0x8a   :  { %91 = vst.msk [vmem:[#allocation2 + $0x10] sm:$0xff] %vm19_vm0, %v86_v10 }
  0x8e   :  { %v76_v14 = vpop.f32.mrf.mxu0  ;;  %v81_v15 = vpop.f32.mrf.mxu1 }
  0x8f   :  { %v85_v16 = vadd.f32 %v76_v14, %v25_v11  ;;  %v87_v17 = vadd.f32 %v81_v15, %v27_v12 }
  0x90   :  { %v96_v18 = vld [vmem:[#allocation2] sm:$0xff] }
  0x91   :  { %v104_v19 = vadd.f32 %v146_v13, %v96_v18  ;;  %v98_v20 = vld [vmem:[#allocation2 + $0x10] sm:$0xff]  ;;  %90 = vst.msk [vmem:[#allocation2 + $0x8] sm:$0xff] %vm19_vm0, %v85_v16 }
  0x92   :  { %v106_v21 = vadd.f32 %v146_v13, %v98_v20  ;;  %92 = vst.msk [vmem:[#allocation2 + $0x18] sm:$0xff] %vm19_vm0, %v87_v17 }
  0x93   :  { %v108_v22 = vpack.c.bf16 %v104_v19, %v104_v19 }
  0x94   :  { %v110_v23 = vpack.c.bf16 %v106_v21, %v106_v21 }
  0x95   :  { %113 = vst.msk [vmem:[%s206_s3] sm:$0xf] %vm112_vm2, %v108_v22 }
  0x96   :  { %115 = vst.msk [vmem:[%s206_s3 + $0x8] sm:$0xf] %vm112_vm2, %v110_v23 }
  0x98   :  { %v97_v24 = vld [vmem:[#allocation2 + $0x8] sm:$0xff] }
  0x99   :  { %v105_v25 = vadd.f32 %v146_v13, %v97_v24  ;;  %v99_v26 = vld [vmem:[#allocation2 + $0x18] sm:$0xff] }
  0x9a   :  { %v107_v27 = vadd.f32 %v146_v13, %v99_v26 }
  0x9b   :  { %v109_v28 = vpack.c.bf16 %v105_v25, %v105_v25 }
  0x9c   :  { %v111_v29 = vpack.c.bf16 %v107_v27, %v107_v27 }
  0x9d   :  { %114 = vst.msk [vmem:[%s206_s3 + $0x4] sm:$0xf] %vm112_vm2, %v109_v28 }
  0x9e   :  { %116 = vst.msk [vmem:[%s206_s3 + $0xc] sm:$0xf] %vm112_vm2, %v111_v29 }

// kernel: text_decoder_forward.24
= control target key start
LH: loop header
LB: loop body
LE: loop exit
PB: predicated region body
PF: predicated region fallthrough
CT: control target
= control target key end

     0   :  { %s1010_s12 = smov 0   ;;  %s1012_s13 = smov 0   ;;  %s1133_s0 = inlined_call_operand.vmem [shape: bf16[8,8,8], index: 0, kind: input, shape index: {}]   ;;  %s1134_s1 = inlined_call_operand.vmem [shape: bf16[8,16,8], index: 1, kind: input, shape index: {}]   ;;  %s1135_s2 = inlined_call_operand.vmem [shape: bf16[8,16,8], index: 2, kind: input, shape index: {}]   ;;  %s1136_s3 = inlined_call_operand.vmem [shape: bf16[8,8,8], index: 3, kind: output, shape index: {}]  }
   0x1   :  { %s1014_s14 = smov 0  }
   0x2 LB: > { %s32_s15 = sadd.s32 1, %s981_s13  ;;  %p837_p0 = scmp.ge.s32.totalorder %s985_s14, 1  ;;  %s985_s14 = sphi %s1014_s14, %s13_s14   ;;  %s981_s13 = sphi %s1012_s13, %s1138_s13   ;;  %s977_s12 = sphi %s1010_s12, %s1137_s12  }
   0x3   : > { %p34_p1 = scmp.ge.s32.totalorder %s32_s15, 2  ;;  %p202_p2 = scmp.lt.s32.totalorder %s985_s14, 3 }
   0x5   : > { %s1140_s15 = smov (%p34_p1, %s32_s15), 0  ;;  %p203_p3 = pnand %p837_p0, %p202_p2 }
   0x6   : > { %s838_s16 = sshll.u32 (!%p203_p3), %s977_s12, 2 }
   0x7   : > { %206 = sbr.rel (%p203_p3) target bundleno = 698 (0x2ba), region = 32  ;;  %p253_p4 = scmp.lt.s32.totalorder (!%p203_p3), %s838_s16, 7 }
   0xc   : > { %s1142_s16 = smov (!%p253_p4, %s838_s16), 7  ;;  %vm308_vm0 = vcmask 64512   ;;  %vm299_vm1 = vcmask 7168   ;;  %v987_v22 = vmov -inf   ;;  %vm438_vm2 = vcmask 130048  }
   0xd   : > { %s890_s17 = sshll.u32 %s1142_s16, 3  ;;  %s839_s18 = sshll.u32 %s1142_s16, 2  ;;  %300 = vst.msk [vmem:[#allocation2] sm:$0xff] %vm299_vm1, %v987_v22  ;;  %v988_v35 = vmov 0   ;;  %v989_v36 = vmov 0.0   ;;  %vm711_vm3 = vcmask 60416  }
   0xe   : > { %s270_s21 = scalar_lea.vmem %s1134_s1, %s890_s17  ;;  %s259_s24 = scalar_lea.vmem %s1133_s0, %s839_s18  ;;  %301 = vst.msk [vmem:[#allocation2 + $0x8] sm:$0xff] %vm299_vm1, %v987_v22  ;;  %937 = vset.pattern.permute.xlu0 %v988_v35  ;;  %936 = vset.pattern.permute.xlu2 %v988_v35 }
   0xf   : > { %v892_v0 = vld [vmem:[%s270_s21] sm:$0xff]  ;;  %v894_v1 = vld [vmem:[%s270_s21 + $0x10] sm:$0xff]  ;;  %v908_v4 = vld [vmem:[%s259_s24 + $0x8] sm:$0xff]   ;;  %302 = vst.msk [vmem:[#allocation2 + $0x10] sm:$0xff] %vm299_vm1, %v987_v22  ;;  %938 = vset.pattern.permute.xlu1 %v988_v35  ;;  %s282_s27 = scalar_lea.vmem %s1135_s2, %s890_s17  ;;  %s292_s30 = scalar_lea.vmem %s1136_s3, %s839_s18 }
  0x10   : > { %v901_v2 = vld [vmem:[%s259_s24] sm:$0xff]   ;;  %v893_v5 = vld [vmem:[%s270_s21 + $0x8] sm:$0xff]  ;;  %v895_v6 = vld [vmem:[%s270_s21 + $0x18] sm:$0xff]  ;;  %v347_v8 = vsel %vm308_vm0, %v892_v0, 0  ;;  %v395_v9 = vsel %vm308_vm0, %v894_v1, 0  ;;  %v906_v10 = vunpack.c.l.bf16 %v908_v4  ;;  %v907_v11 = vunpack.c.h.bf16 %v908_v4  ;;  %303 = vst.msk [vmem:[#allocation2 + $0x18] sm:$0xff] %vm299_vm1, %v987_v22 }
  0x11   : > { %v902_v3 = vunpack.c.l.bf16 %v901_v2  ;;  %v903_v7 = vunpack.c.h.bf16 %v901_v2  ;;  %356 = vmatpush.bf16.xpose.msra.mxu0 %v347_v8  ;;  %404 = vmatpush.bf16.xpose.msra.mxu2 %v395_v9  ;;  %v371_v13 = vsel %vm308_vm0, %v893_v5, 0  ;;  %v419_v14 = vsel %vm308_vm0, %v895_v6, 0  ;;  %306 = vst.msk [vmem:[#allocation3 + $0x10] sm:$0xff] %vm299_vm1, %v989_v36  ;;  %v898_v53 = vld [vmem:[%s282_s27 + $0x10] sm:$0xff]  ;;  %v899_v54 = vld [vmem:[%s282_s27 + $0x18] sm:$0xff]  ;;  %v896_v55 = vld [vmem:[%s282_s27] sm:$0xff] }
  0x12   : > { %v323_v16 = vmul.f32 0.35355338, %v906_v10  ;;  %380 = vmatpush.bf16.xpose.msra.mxu1 %v371_v13  ;;  %428 = vmatpush.bf16.xpose.msra.mxu3 %v419_v14  ;;  %v324_v17 = vmul.f32 0.35355338, %v907_v11  ;;  %304 = vst.msk [vmem:[#allocation3] sm:$0xff] %vm299_vm1, %v989_v36  ;;  %v897_v57 = vld [vmem:[%s282_s27 + $0x8] sm:$0xff] }
  0x13   : > { %v321_v12 = vmul.f32 0.35355338, %v902_v3  ;;  %v322_v15 = vmul.f32 0.35355338, %v903_v7  ;;  %305 = vst.msk [vmem:[#allocation3 + $0x8] sm:$0xff] %vm299_vm1, %v989_v36 }
  0x14   : > { %v327_v19 = vpack.c.bf16 %v323_v16, %v323_v16  ;;  %v328_v21 = vpack.c.bf16 %v324_v17, %v324_v17  ;;  %307 = vst.msk [vmem:[#allocation3 + $0x18] sm:$0xff] %vm299_vm1, %v989_v36  ;;  %v1072_v37 = vld [vmem:[#allocation2] sm:$0xff] }
  0x15   : > { %v325_v18 = vpack.c.bf16 %v321_v12, %v321_v12  ;;  %v326_v20 = vpack.c.bf16 %v322_v15, %v322_v15  ;;  %309 = vst.msk [vmem:[#allocation4] sm:$0xff] %vm308_vm0, %v989_v36  ;;  %v435_v43 = vld [vmem:[#allocation2 + $0x8] sm:$0xff] }
  0x16   : > { %310 = vst.msk [vmem:[#allocation4 + $0x8] sm:$0xff] %vm308_vm0, %v989_v36  ;;  %v1082_v41 = vld [vmem:[#allocation2 + $0x10] sm:$0xff] }
  0x17   : > { %311 = vst.msk [vmem:[#allocation4 + $0x10] sm:$0xff] %vm308_vm0, %v989_v36  ;;  %v1088_v49 = vld [vmem:[#allocation2 + $0x18] sm:$0xff] }
  0x18   : > { %852 = vmatmul.msk.bf16.vlgmr.msra.gmra.mxu0 %vm308_vm0, %v325_v18  ;;  %862 = vmatmul.msk.bf16.vlgmr.msra.gmra.mxu2 %vm308_vm0, %v327_v19  ;;  %312 = vst.msk [vmem:[#allocation4 + $0x18] sm:$0xff] %vm308_vm0, %v989_v36 }
  0x19   : > { %857 = vmatmul.msk.bf16.vlgmr.msra.gmra.mxu1 %vm308_vm0, %v326_v20  ;;  %867 = vmatmul.msk.bf16.vlgmr.msra.gmra.mxu3 %vm308_vm0, %v328_v21 }
  0x1a   : > { %628 = vmatpush.bf16.msrb.mxu2 %v898_v53  ;;  %650 = vmatpush.bf16.msrb.mxu3 %v899_v54  ;;  %v500_v36 = vld [vmem:[#allocation3 + $0x8] sm:$0xff] }
  0x1b   : > { %584 = vmatpush.bf16.msrb.mxu0 %v896_v55  ;;  %606 = vmatpush.bf16.msrb.mxu1 %v897_v57 }
  0x95   : > { %v1054_v23 = vpop.f32.mrf.mxu0 }
  0x96   : > { %v439_v24 = vsel %vm438_vm2, %v1054_v23, -inf  ;;  %v1058_v25 = vpop.f32.mrf.mxu1 }
  0x97   : > { %440 = vmax.xlane.f32.xlu1 %v439_v24  ;;  %v442_v28 = vsel %vm438_vm2, %v1058_v25, -inf  ;;  %v501_v24 = vld [vmem:[#allocation3 + $0x10] sm:$0xff] }
  0x9b   : > { %v406_v26 = vpop.f32.mrf.mxu2 }
  0x9c   : > { %v445_v27 = vsel %vm438_vm2, %v406_v26, -inf  ;;  %v430_v29 = vpop.f32.mrf.mxu3 }
  0x9d   : > { %446 = vmax.xlane.f32.xlu0 %v445_v27  ;;  %v360_v30 = vpop.f32.mrf.mxu0  ;;  %v448_v32 = vsel %vm438_vm2, %v430_v29, -inf }
  0x9e   : > { %v384_v31 = vpop.f32.mrf.mxu1  ;;  %v499_v30 = vld [vmem:[#allocation3] sm:$0xff] }
  0x9f   : > { %443 = vmax.xlane.f32.xlu1 %v442_v28 }
  0xa3   : > { %v408_v33 = vpop.f32.mrf.mxu2 }
  0xa4   : > { %v432_v34 = vpop.f32.mrf.mxu3 }
  0xa5   : > { %449 = vmax.xlane.f32.xlu0 %v448_v32 }
 0x10a   : > { %v441_v38 = vpop.xlane.xlu1 %440 }
 0x10b   : > { %v1075_v39 = vmax.f32 %v1072_v37, %v441_v38 }
 0x10d   : > { %v455_v40 = vsub.f32 %v1072_v37, %v1075_v39  ;;  %664 = vst.msk [vmem:[#allocation2] sm:$0xff] %vm299_vm1, %v1075_v39  ;;  %469 = vperm.xlu0 %937, %v1075_v39   ;;  %v528_v37 = vld [vmem:[#allocation4] sm:$0xff] }
 0x10f   : > { %v459_v16 = vmul.f32 1.442695, %v455_v40 }
 0x110   : > { %v447_v42 = vpop.xlane.xlu0 %446 }
 0x111   : > { %v453_v44 = vmax.f32 %v1082_v41, %v447_v42 }
 0x112   : > { %v444_v45 = vpop.xlane.xlu1 %443 }
 0x113   : > { %v457_v46 = vsub.f32 %v1082_v41, %v453_v44  ;;  %666 = vst.msk [vmem:[#allocation2 + $0x10] sm:$0xff] %vm299_vm1, %v453_v44  ;;  %v452_v47 = vmax.f32 %v435_v43, %v444_v45  ;;  %479 = vperm.xlu2 %936, %v453_v44  }
 0x115   : > { %v456_v48 = vsub.f32 %v435_v43, %v452_v47  ;;  %665 = vst.msk [vmem:[#allocation2 + $0x8] sm:$0xff] %vm299_vm1, %v452_v47  ;;  %474 = vperm.xlu1 %938, %v452_v47   ;;  %v463_v17 = vmul.f32 1.442695, %v457_v46 }
 0x117   : > { %v461_v18 = vmul.f32 1.442695, %v456_v48  ;;  %v530_v48 = vld [vmem:[#allocation4 + $0x10] sm:$0xff] }
 0x118   : > { %v450_v50 = vpop.xlane.xlu0 %449 }
 0x119   : > { %v454_v51 = vmax.f32 %v1088_v49, %v450_v50 }
 0x11b   : > { %v458_v52 = vsub.f32 %v1088_v49, %v454_v51  ;;  %667 = vst.msk [vmem:[#allocation2 + $0x18] sm:$0xff] %vm299_vm1, %v454_v51  ;;  %484 = vperm.xlu2 %936, %v454_v51  }
 0x16d   : > { %v480_v56 = vpop.permute.xlu2 %479 }
 0x16e   : > { %v489_v58 = vsub.f32 %v406_v26, %v480_v56 }
 0x170   : > { %v495_v59 = vmul.f32 1.442695, %v489_v58 }
 0x172   : > { %939 = vpow2.f32 %v495_v59  ;;  %v529_v59 = vld [vmem:[#allocation4 + $0x8] sm:$0xff] }
 0x175   : > { %v485_v60 = vpop.permute.xlu2 %484 }
 0x176   : > { %v490_v61 = vsub.f32 %v430_v29, %v485_v60 }
 0x178   : > { %v940_v62 = vpop.eup %939  ;;  %v497_v63 = vmul.f32 1.442695, %v490_v61 }
 0x179   : > { %v513_v0 = vsel %vm438_vm2, %v940_v62, 0.0  ;;  %v558_v1 = vpack.c.bf16 %v940_v62, %v940_v62 }
 0x17a   : > { %941 = vpow2.f32 %v497_v63  ;;  %514 = vadd.xlane.f32.xlu0 %v513_v0  ;;  %v502_v63 = vld [vmem:[#allocation3 + $0x18] sm:$0xff] }
 0x17b   : > { %882 = vmatmul.msk.bf16.vlgmr.msrb.gmra.mxu2 %vm438_vm2, %v558_v1 }
 0x17f   : > { %v470_v2 = vpop.permute.xlu0 %469 }
 0x180   : > { %v942_v3 = vpop.eup %941  ;;  %v487_v4 = vsub.f32 %v1054_v23, %v470_v2  ;;  %v465_v23 = vmul.f32 1.442695, %v458_v52 }
 0x181   : > { %v559_v5 = vpack.c.bf16 %v942_v3, %v942_v3  ;;  %v516_v22 = vsel %vm438_vm2, %v942_v3, 0.0  ;;  %v531_v3 = vld [vmem:[#allocation4 + $0x18] sm:$0xff] }
 0x182   : > { %v491_v6 = vmul.f32 1.442695, %v487_v4 }
 0x183   : > { %887 = vmatmul.msk.bf16.vlgmr.msrb.gmra.mxu3 %vm438_vm2, %v559_v5 }
 0x184   : > { %943 = vpow2.f32 %v491_v6 }
 0x187   : > { %v475_v7 = vpop.permute.xlu1 %474 }
 0x188   : > { %v488_v8 = vsub.f32 %v1058_v25, %v475_v7 }
 0x18a   : > { %v944_v9 = vpop.eup %943  ;;  %v493_v10 = vmul.f32 1.442695, %v488_v8 }
 0x18b   : > { %v507_v11 = vsel %vm438_vm2, %v944_v9, 0.0  ;;  %v556_v12 = vpack.c.bf16 %v944_v9, %v944_v9 }
 0x18c   : > { %945 = vpow2.f32 %v493_v10  ;;  %508 = vadd.xlane.f32.xlu2 %v507_v11 }
 0x18d   : > { %872 = vmatmul.msk.bf16.vlgmr.msrb.gmra.mxu0 %vm438_vm2, %v556_v12  ;;  %947 = vpow2.f32 %v459_v16 }
 0x18e   : > { %949 = vpow2.f32 %v463_v17 }
 0x18f   : > { %951 = vpow2.f32 %v461_v18 }
 0x190   : > { %953 = vpow2.f32 %v465_v23 }
 0x192   : > { %v946_v13 = vpop.eup %945 }
 0x193   : > { %v510_v14 = vsel %vm438_vm2, %v946_v13, 0.0  ;;  %v557_v15 = vpack.c.bf16 %v946_v13, %v946_v13  ;;  %v948_v19 = vpop.eup %947 }
 0x194   : > { %511 = vadd.xlane.f32.xlu1 %v510_v14  ;;  %v950_v20 = vpop.eup %949  ;;  %v503_v33 = vmul.f32 %v948_v19, %v499_v30 }
 0x195   : > { %877 = vmatmul.msk.bf16.vlgmr.msrb.gmra.mxu1 %vm438_vm2, %v557_v15  ;;  %v952_v21 = vpop.eup %951  ;;  %v505_v26 = vmul.f32 %v950_v20, %v501_v24 }
 0x196   : > { %v954_v25 = vpop.eup %953  ;;  %v504_v40 = vmul.f32 %v952_v21, %v500_v36 }
 0x197   : > { %v506_v0 = vmul.f32 %v954_v25, %v502_v63 }
 0x1a4   : > { %534 = vperm.xlu2 %936, %v948_v19  }
 0x1ac   : > { %544 = vperm.xlu2 %936, %v950_v20  }
 0x1ad   : > { %539 = vperm.xlu1 %938, %v952_v21  }
 0x1d5   : > { %517 = vadd.xlane.f32.xlu2 %v516_v22 }
 0x1ed   : > { %v515_v27 = vpop.xlane.xlu0 %514  ;;  %549 = vperm.xlu2 %936, %v954_v25  }
 0x1ee   : > { %v521_v28 = vadd.f32 %v515_v27, %v505_v26 }
 0x1f0   : > { %526 = vst.msk [vmem:[#allocation3 + $0x10] sm:$0xff] %vm299_vm1, %v521_v28 }
 0x1f7   : > { %v673_v29 = vld [vmem:[#allocation3 + $0x10] sm:$0xff] }
 0x1f8   : > { %955 = vrcp.f32 %v673_v29 }
 0x1fe   : > { %v956_v31 = vpop.eup %955  ;;  %v630_v32 = vpop.f32.mrf.mxu2 }
 0x1ff   : > { %v509_v34 = vpop.xlane.xlu2 %508  ;;  %695 = vperm.xlu1 %938, %v956_v31  }
 0x200   : > { %v519_v35 = vadd.f32 %v509_v34, %v503_v33 }
 0x202   : > { %524 = vst.msk [vmem:[#allocation3] sm:$0xff] %vm299_vm1, %v519_v35 }
 0x206   : > { %v632_v38 = vpop.f32.mrf.mxu2  ;;  %v652_v39 = vpop.f32.mrf.mxu3 }
 0x207   : > { %v535_v41 = vpop.permute.xlu2 %534  ;;  %v512_v42 = vpop.xlane.xlu1 %511 }
 0x208   : > { %v552_v43 = vmul.f32 %v535_v41, %v528_v37  ;;  %v520_v44 = vadd.f32 %v512_v42, %v504_v40 }
 0x209   : > { %v671_v45 = vld [vmem:[#allocation3] sm:$0xff] }
 0x20a   : > { %525 = vst.msk [vmem:[#allocation3 + $0x8] sm:$0xff] %vm299_vm1, %v520_v44  ;;  %v586_v46 = vpop.f32.mrf.mxu0  ;;  %957 = vrcp.f32 %v671_v45 }
 0x20b   : > { %v656_v47 = vadd.f32 %v586_v46, %v552_v43 }
 0x20d   : > { %660 = vst.msk [vmem:[#allocation4] sm:$0xff] %vm308_vm0, %v656_v47 }
 0x20e   : > { %v654_v49 = vpop.f32.mrf.mxu3 }
 0x20f   : > { %v545_v50 = vpop.permute.xlu2 %544 }
 0x210   : > { %v958_v51 = vpop.eup %957  ;;  %v554_v52 = vmul.f32 %v545_v50, %v530_v48 }
 0x211   : > { %685 = vperm.xlu0 %937, %v958_v51   ;;  %v672_v53 = vld [vmem:[#allocation3 + $0x8] sm:$0xff] }
 0x212   : > { %v658_v54 = vadd.f32 %v630_v32, %v554_v52  ;;  %v588_v55 = vpop.f32.mrf.mxu0  ;;  %v608_v56 = vpop.f32.mrf.mxu1  ;;  %959 = vrcp.f32 %v672_v53 }
 0x214   : > { %662 = vst.msk [vmem:[#allocation4 + $0x10] sm:$0xff] %vm308_vm0, %v658_v54  ;;  %v679_v15 = vld [vmem:[#allocation4] sm:$0xff] }
 0x218   : > { %v960_v57 = vpop.eup %959 }
 0x219   : > { %690 = vperm.xlu2 %936, %v960_v57  }
 0x21a   : > { %v610_v58 = vpop.f32.mrf.mxu1 }
 0x21b   : > { %v681_v12 = vld [vmem:[#allocation4 + $0x10] sm:$0xff] }
 0x21f   : > { %v540_v60 = vpop.permute.xlu1 %539 }
 0x220   : > { %v553_v61 = vmul.f32 %v540_v60, %v529_v59 }
 0x222   : > { %v657_v62 = vadd.f32 %v608_v56, %v553_v61 }
 0x224   : > { %661 = vst.msk [vmem:[#allocation4 + $0x8] sm:$0xff] %vm308_vm0, %v657_v62 }
 0x22b   : > { %v680_v11 = vld [vmem:[#allocation4 + $0x8] sm:$0xff] }
 0x248   : > { %v518_v1 = vpop.xlane.xlu2 %517 }
 0x249   : > { %v522_v2 = vadd.f32 %v518_v1, %v506_v0 }
 0x24b   : > { %527 = vst.msk [vmem:[#allocation3 + $0x18] sm:$0xff] %vm299_vm1, %v522_v2 }
 0x250   : > { %v550_v4 = vpop.permute.xlu2 %549 }
 0x251   : > { %v555_v5 = vmul.f32 %v550_v4, %v531_v3 }
 0x252   : > { %v674_v6 = vld [vmem:[#allocation3 + $0x18] sm:$0xff] }
 0x253   : > { %v659_v7 = vadd.f32 %v652_v39, %v555_v5  ;;  %961 = vrcp.f32 %v674_v6 }
 0x255   : > { %663 = vst.msk [vmem:[#allocation4 + $0x18] sm:$0xff] %vm308_vm0, %v659_v7 }
 0x259   : > { %v962_v8 = vpop.eup %961 }
 0x25a   : > { %700 = vperm.xlu2 %936, %v962_v8  }
 0x25c   : > { %v682_v21 = vld [vmem:[#allocation4 + $0x18] sm:$0xff] }
 0x271   : > { %v696_v10 = vpop.permute.xlu1 %695 }
 0x272   : > { %v705_v16 = vmul.f32 %v696_v10, %v681_v12 }
 0x273   : > { %v691_v9 = vpop.permute.xlu2 %690 }
 0x274   : > { %v704_v13 = vmul.f32 %v691_v9, %v680_v11  ;;  %v709_v20 = vpack.c.bf16 %v705_v16, %v705_v16 }
 0x276   : > { %v708_v19 = vpack.c.bf16 %v704_v13, %v704_v13  ;;  %714 = vst.msk [vmem:[%s292_s30 + $0x8] sm:$0xf] %vm711_vm3, %v709_v20 }
 0x278   : > { %713 = vst.msk [vmem:[%s292_s30 + $0x4] sm:$0xf] %vm711_vm3, %v708_v19 }
 0x283   : > { %v686_v14 = vpop.permute.xlu0 %685 }
 0x284   : > { %v703_v17 = vmul.f32 %v686_v14, %v679_v15 }
 0x286   : > { %v707_v18 = vpack.c.bf16 %v703_v17, %v703_v17 }
 0x288   : > { %712 = vst.msk [vmem:[%s292_s30] sm:$0xf] %vm711_vm3, %v707_v18 }
 0x2b4   : > { %v701_v22 = vpop.permute.xlu2 %700 }
 0x2b5   : > { %v706_v23 = vmul.f32 %v701_v22, %v682_v21 }
 0x2b7   : > { %v710_v24 = vpack.c.bf16 %v706_v23, %v706_v23 }
 0x2b9   : > { %715 = vst.msk [vmem:[%s292_s30 + $0xc] sm:$0xf] %vm711_vm3, %v710_v24 }
 0x2ba PF: > { %s13_s14 = sadd.s32 1, %s985_s14   ;;  %s1137_s12 = smov %s981_s13 }
 0x2bb   : > { %p10_p5 = scmp.ge.s32.totalorder %s13_s14, 4   ;;  %s1138_s13 = smov %s1140_s15 }
 0x2bd   :  { %12 = sbr.rel (!%p10_p5) target bundleno = 2 (0x2), region = 76 }

// kernel: text_decoder_forward.27
= control target key start
LH: loop header
LB: loop body
LE: loop exit
PB: predicated region body
PF: predicated region fallthrough
CT: control target
= control target key end

     0   :  { %vm21_vm0 = vcmask 261120   ;;  %v194_v2 = vmov 0.0   ;;  %vm136_vm1 = vcmask 257024   ;;  %s263_s1 = inlined_call_operand.vmem [shape: bf16[128,32], index: 1, kind: input, shape index: {}]   ;;  %s264_s2 = inlined_call_operand.vmem [shape: f32[1,32], index: 2, kind: input, shape index: {}]   ;;  %s265_s0 = inlined_call_operand.vmem [shape: bf16[16,128], index: 0, kind: input, shape index: {}]   ;;  %s266_s3 = inlined_call_operand.vmem [shape: bf16[16,32], index: 3, kind: input, shape index: {}]   ;;  %s267_s4 = inlined_call_operand.vmem [shape: bf16[16,32], index: 4, kind: output, shape index: {}]  }
   0x1   :  { %v187_v0 = vld [vmem:[%s263_s1 + $0x38] sm:$0xff]  ;;  %v186_v1 = vld [vmem:[%s263_s1 + $0x30] sm:$0xff]  ;;  %22 = vst.msk [vmem:[#allocation2] sm:$0xff] %vm21_vm0, %v194_v2  ;;  %v185_v3 = vld [vmem:[%s263_s1 + $0x28] sm:$0xff] }
   0x2   :  { %98 = vmatpush.bf16.msra.mxu0 %v187_v0  ;;  %23 = vst.msk [vmem:[#allocation2 + $0x8] sm:$0xff] %vm21_vm0, %v194_v2  ;;  %v184_v4 = vld [vmem:[%s263_s1 + $0x20] sm:$0xff]  ;;  %v183_v5 = vld [vmem:[%s263_s1 + $0x18] sm:$0xff]  ;;  %v182_v6 = vld [vmem:[%s263_s1 + $0x10] sm:$0xff] }
   0x3   :  { %v181_v7 = vld [vmem:[%s263_s1 + $0x8] sm:$0xff]  ;;  %v180_v8 = vld [vmem:[%s263_s1] sm:$0xff] }
   0x4   :  { %v179_v9 = vld [vmem:[%s265_s0] sm:$0xff] }
   0x5   :  { %v189_v13 = vld [vmem:[%s266_s3] sm:$0xff]  }
   0x6   :  { %99 = vmatpush.bf16.msra.mxu0 %v186_v1  ;;  %v193_v15 = vld [vmem:[%s264_s2] ss:$0 sm:$0xff]  ;;  %v190_v17 = vunpack.c.l.bf16 %v189_v13  ;;  %v191_v23 = vunpack.c.h.bf16 %v189_v13 }
   0x8   :  { %v24_v10 = vld [vmem:[#allocation2] sm:$0xff] }
   0x9   :  { %v25_v14 = vld [vmem:[#allocation2 + $0x8] sm:$0xff] }
   0xa   :  { %100 = vmatpush.bf16.msra.mxu0 %v185_v3 }
   0xe   :  { %101 = vmatpush.bf16.msra.mxu0 %v184_v4 }
  0x12   :  { %102 = vmatpush.bf16.msra.mxu0 %v183_v5 }
  0x16   :  { %103 = vmatpush.bf16.msra.mxu0 %v182_v6 }
  0x1a   :  { %104 = vmatpush.bf16.msra.mxu0 %v181_v7 }
  0x1e   :  { %105 = vmatpush.bf16.msra.mxu0 %v180_v8 }
  0x21   :  { %106 = vmatmul.bf16.vlgmr.msra.gmra.mxu0 %v179_v9 }
  0x9e   :  { %v107_v11 = vpop.f32.mrf.mxu0 }
  0x9f   :  { %v112_v12 = vadd.f32 %v107_v11, %v24_v10 }
  0xa1   :  { %115 = vst.msk [vmem:[#allocation2] sm:$0xff] %vm21_vm0, %v112_v12 }
  0xa6   :  { %v109_v16 = vpop.f32.mrf.mxu0 }
  0xa7   :  { %v113_v18 = vadd.f32 %v109_v16, %v25_v14 }
  0xa8   :  { %v120_v19 = vld [vmem:[#allocation2] sm:$0xff] }
  0xa9   :  { %v126_v20 = vadd.f32 %v193_v15, %v120_v19  ;;  %116 = vst.msk [vmem:[#allocation2 + $0x8] sm:$0xff] %vm21_vm0, %v113_v18 }
  0xab   :  { %v132_v21 = vadd.f32 %v190_v17, %v126_v20 }
  0xad   :  { %v134_v22 = vpack.c.bf16 %v132_v21, %v132_v21 }
  0xaf   :  { %137 = vst.msk [vmem:[%s267_s4] sm:$0xf] %vm136_vm1, %v134_v22 }
  0xb0   :  { %v121_v24 = vld [vmem:[#allocation2 + $0x8] sm:$0xff] }
  0xb1   :  { %v127_v25 = vadd.f32 %v193_v15, %v121_v24 }
  0xb3   :  { %v133_v26 = vadd.f32 %v191_v23, %v127_v25 }
  0xb5   :  { %v135_v27 = vpack.c.bf16 %v133_v26, %v133_v26 }
  0xb7   :  { %138 = vst.msk [vmem:[%s267_s4 + $0x4] sm:$0xf] %vm136_vm1, %v135_v27 }

// kernel: text_decoder_forward.26
= control target key start
LH: loop header
LB: loop body
LE: loop exit
PB: predicated region body
PF: predicated region fallthrough
CT: control target
= control target key end

     0   :  { %vm25_vm0 = vcmask 261120   ;;  %v187_v5 = vmov 32.0   ;;  %s244_s0 = inlined_call_operand.vmem [shape: bf16[16,32], index: 0, kind: input, shape index: {}]   ;;  %s245_s1 = inlined_call_operand.vmem [shape: f32[1,32], index: 1, kind: input, shape index: {}]   ;;  %s246_s2 = inlined_call_operand.vmem [shape: f32[1,32], index: 2, kind: input, shape index: {}]   ;;  %s247_s4 = inlined_call_operand.vmem [shape: f32[1,128], index: 4, kind: input, shape index: {}]   ;;  %s248_s3 = inlined_call_operand.vmem [shape: bf16[32,128], index: 3, kind: input, shape index: {}]   ;;  %s249_s5 = inlined_call_operand.vmem [shape: bf16[16,128], index: 5, kind: output, shape index: {}]  }
   0x1   :  { %v165_v0 = vld [vmem:[%s244_s0] sm:$0xff]   ;;  %177 = vrcp.f32 %v187_v5  ;;  %v163_v22 = vld [vmem:[%s248_s3 + $0x8] sm:$0xff] }
   0x2   :  { %v166_v1 = vunpack.c.l.bf16 %v165_v0  ;;  %v167_v3 = vunpack.c.h.bf16 %v165_v0  ;;  %119 = vmatpush.bf16.msra.mxu0 %v163_v22  ;;  %v162_v24 = vld [vmem:[%s248_s3] sm:$0xff] }
   0x3   :  { %v174_v43 = vld [vmem:[%s245_s1] ss:$0 sm:$0xff] }
   0x4   :  { %v26_v2 = vsel %vm25_vm0, %v166_v1, 0.0  ;;  %v29_v4 = vsel %vm25_vm0, %v167_v3, 0.0  ;;  %v175_v48 = vld [vmem:[%s246_s2] ss:$0 sm:$0xff] }
   0x5   :  { %27 = vadd.xlane.f32.xlu0 %v26_v2  ;;  %v176_v53 = vld [vmem:[%s247_s4] ss:$0 sm:$0xff] }
   0x6   :  { %120 = vmatpush.bf16.msra.mxu0 %v162_v24 }
   0x7   :  { %v178_v6 = vpop.eup %177 }
   0x8   :  { %v33_v7 = vmul.f32 32.0, %v178_v6  ;;  %vm37_vm1 = vweird.f32 %v178_v6 }
   0xa   :  { %v34_v8 = vsub.f32 1.0, %v33_v7 }
   0xc   :  { %v35_v9 = vmul.f32 %v178_v6, %v34_v8 }
   0xd   :  { %30 = vadd.xlane.f32.xlu0 %v29_v4 }
   0xe   :  { %v36_v10 = vadd.f32 %v178_v6, %v35_v9 }
  0x10   :  { %v38_v11 = vsel %vm37_vm1, %v178_v6, %v36_v10 }
  0x78   :  { %v28_v12 = vpop.xlane.xlu0 %27 }
  0x79   :  { %v39_v13 = vmul.f32 %v38_v11, %v28_v12 }
  0x7b   :  { %v41_v14 = vsub.f32 %v166_v1, %v39_v13 }
  0x7d   :  { %v43_v15 = vmul.f32 %v41_v14, %v41_v14 }
  0x7f   :  { %v45_v16 = vsel %vm25_vm0, %v43_v15, 0.0 }
  0x80   :  { %46 = vadd.xlane.f32.xlu1 %v45_v16  ;;  %v31_v17 = vpop.xlane.xlu0 %30 }
  0x81   :  { %v40_v18 = vmul.f32 %v38_v11, %v31_v17 }
  0x83   :  { %v42_v19 = vsub.f32 %v167_v3, %v40_v18 }
  0x85   :  { %v44_v20 = vmul.f32 %v42_v19, %v42_v19 }
  0x87   :  { %v48_v21 = vsel %vm25_vm0, %v44_v20, 0.0 }
  0x88   :  { %49 = vadd.xlane.f32.xlu1 %v48_v21 }
  0xf3   :  { %v47_v23 = vpop.xlane.xlu1 %46 }
  0xf4   :  { %v51_v25 = vmul.f32 %v47_v23, %v38_v11 }
  0xf6   :  { %v53_v26 = vadd.f32 1e-05, %v51_v25 }
  0xf8   :  { %179 = vrsqrt.f32 %v53_v26  ;;  %vm61_vm3 = vweird.f32 %v53_v26 }
  0xfb   :  { %v50_v27 = vpop.xlane.xlu1 %49 }
  0xfc   :  { %v52_v28 = vmul.f32 %v50_v27, %v38_v11 }
  0xfe   :  { %v180_v29 = vpop.eup %179  ;;  %v54_v30 = vadd.f32 1e-05, %v52_v28 }
  0xff   :  { %v56_v31 = vmul.f32 %v180_v29, %v53_v26  ;;  %vm62_vm2 = vweird.f32 %v180_v29 }
 0x100   :  { %181 = vrsqrt.f32 %v54_v30  ;;  %vm63_vm4 = vmor %vm61_vm3, %vm62_vm2  ;;  %vm71_vm6 = vweird.f32 %v54_v30 }
 0x101   :  { %v57_v32 = vmul.f32 %v180_v29, %v56_v31 }
 0x103   :  { %v58_v33 = vmul.f32 0.5, %v57_v32 }
 0x105   :  { %v59_v34 = vsub.f32 1.5, %v58_v33 }
 0x106   :  { %v182_v35 = vpop.eup %181 }
 0x107   :  { %v60_v36 = vmul.f32 %v180_v29, %v59_v34  ;;  %v66_v37 = vmul.f32 %v182_v35, %v54_v30  ;;  %vm72_vm5 = vweird.f32 %v182_v35 }
 0x108   :  { %vm73_vm7 = vmor %vm71_vm6, %vm72_vm5 }
 0x109   :  { %v67_v38 = vmul.f32 %v182_v35, %v66_v37  ;;  %v64_v39 = vsel %vm63_vm4, %v180_v29, %v60_v36 }
 0x10a   :  { %v75_v42 = vmul.f32 %v64_v39, %v41_v14 }
 0x10b   :  { %v68_v40 = vmul.f32 0.5, %v67_v38 }
 0x10c   :  { %v81_v47 = vmul.f32 %v174_v43, %v75_v42 }
 0x10d   :  { %v69_v41 = vsub.f32 1.5, %v68_v40 }
 0x10e   :  { %v87_v50 = vadd.f32 %v175_v48, %v81_v47 }
 0x10f   :  { %v70_v44 = vmul.f32 %v182_v35, %v69_v41 }
 0x111   :  { %v74_v45 = vsel %vm73_vm7, %v182_v35, %v70_v44 }
 0x112   :  { %v76_v46 = vmul.f32 %v74_v45, %v42_v19 }
 0x114   :  { %v82_v49 = vmul.f32 %v174_v43, %v76_v46 }
 0x116   :  { %v88_v51 = vadd.f32 %v175_v48, %v82_v49 }
 0x118   :  { %v89_v52 = vpack.c.bf16 %v88_v51, %v87_v50 }
 0x11a   :  { %161 = vmatmul.msk.bf16.vlgmr.msra.gmra.mxu0 %vm25_vm0, %v89_v52 }
 0x197   :  { %v122_v54 = vpop.f32.mrf.mxu0 }
 0x198   :  { %v123_v55 = vadd.f32 %v176_v53, %v122_v54 }
 0x19a   :  { %v127_v56 = vmul.f32 %v123_v55, %v123_v55 }
 0x19c   :  { %v129_v57 = vmul.f32 %v127_v56, %v123_v55 }
 0x19e   :  { %v131_v58 = vmul.f32 0.044715, %v129_v57 }
 0x19f   :  { %v124_v59 = vpop.f32.mrf.mxu0 }
 0x1a0   :  { %v133_v60 = vadd.f32 %v131_v58, %v123_v55  ;;  %v125_v61 = vadd.f32 %v176_v53, %v124_v59 }
 0x1a2   :  { %v135_v62 = vmul.f32 0.7978846, %v133_v60  ;;  %v128_v63 = vmul.f32 %v125_v61, %v125_v61 }
 0x1a4   :  { %v130_v0 = vmul.f32 %v128_v63, %v125_v61  ;;  %183 = vtanh.f32 %v135_v62 }
 0x1a6   :  { %v132_v1 = vmul.f32 0.044715, %v130_v0 }
 0x1a8   :  { %v134_v2 = vadd.f32 %v132_v1, %v125_v61 }
 0x1aa   :  { %v136_v3 = vmul.f32 0.7978846, %v134_v2  ;;  %v184_v4 = vpop.eup %183 }
 0x1ab   :  { %v139_v5 = vadd.f32 1.0, %v184_v4 }
 0x1ac   :  { %185 = vtanh.f32 %v136_v3 }
 0x1ad   :  { %v141_v7 = vmul.f32 0.5, %v139_v5 }
 0x1af   :  { %v143_v10 = vmul.f32 %v141_v7, %v123_v55 }
 0x1b2   :  { %v186_v6 = vpop.eup %185 }
 0x1b3   :  { %v140_v8 = vadd.f32 1.0, %v186_v6 }
 0x1b5   :  { %v142_v9 = vmul.f32 0.5, %v140_v8 }
 0x1b7   :  { %v144_v11 = vmul.f32 %v142_v9, %v125_v61 }
 0x1b9   :  { %v171_v12 = vpack.c.bf16 %v144_v11, %v143_v10 }
 0x1bb   :  { %172 = vst [vmem:[%s249_s5] sm:$0xff] %v171_v12  }

// kernel: text_decoder_forward.37
= control target key start
LH: loop header
LB: loop body
LE: loop exit
PB: predicated region body
PF: predicated region fallthrough
CT: control target
= control target key end

     0   :  { %vm26_vm0 = vcmask 261120   ;;  %s263_s0 = inlined_call_operand.vmem [shape: bf16[16,32], index: 0, kind: input, shape index: {}]   ;;  %s264_s1 = inlined_call_operand.vmem [shape: f32[1,32], index: 1, kind: input, shape index: {}]   ;;  %s265_s2 = inlined_call_operand.vmem [shape: f32[1,32], index: 2, kind: input, shape index: {}]   ;;  %s266_s3 = inlined_call_operand.vmem [shape: bf16[32,64], index: 3, kind: input, shape index: {}]   ;;  %s267_s4 = inlined_call_operand.vmem [shape: f32[1,64], index: 4, kind: input, shape index: {}]   ;;  %s268_s5 = inlined_call_operand.hbm [shape: f32[16,64], index: 5, kind: output, shape index: {}]  }
   0x1   :  { %v161_v0 = vld [vmem:[%s263_s0] sm:$0xff]  }
   0x2   :  { %v162_v1 = vunpack.c.l.bf16 %v161_v0 }
   0x3   :  { %10 = vsyncpa [#allocation3], 0  ;;  %v163_v3 = vunpack.c.h.bf16 %v161_v0  ;;  %v203_v5 = vmov 32.0   ;;  %v159_v22 = vld [vmem:[%s266_s3 + $0x8] sm:$0xff]  ;;  %v158_v24 = vld [vmem:[%s266_s3] sm:$0xff]  ;;  %vm128_vm8 = vcmask 523264  }
   0x4   :  { %v27_v2 = vsel %vm26_vm0, %v162_v1, 0.0  ;;  %171 = vrcp.f32 %v203_v5  ;;  %120 = vmatpush.bf16.msra.mxu0 %v159_v22  ;;  %v168_v43 = vld [vmem:[%s264_s1] ss:$0 sm:$0xff]  ;;  %s204_s1 = smov [#allocation2]   ;;  %s205_s6 = smov 128  }
   0x5   :  { %28 = vadd.xlane.f32.xlu0 %v27_v2  ;;  %v30_v4 = vsel %vm26_vm0, %v163_v3, 0.0  ;;  %v169_v48 = vld [vmem:[%s265_s2] ss:$0 sm:$0xff]  ;;  %s135_s28 = sshll.u32 %s204_s1, 4  ;;  %s137_s2 = sshll.u32 %s268_s5, 4  ;;  %s136_s28 = int_to_ptr.vmem [resolvable:$true] %s135_s28  ;;  %s138_s2 = int_to_ptr.hbm [resolvable:$true] %s137_s2 }
   0x6   :  { %v170_v53 = vld [vmem:[%s267_s4] ss:$0 sm:$0xff]  ;;  %s206_s7 = smov 8  }
   0x8   :  { %121 = vmatpush.bf16.msra.mxu0 %v158_v24 }
   0xa   :  { %v172_v6 = vpop.eup %171 }
   0xb   :  { %v34_v7 = vmul.f32 32.0, %v172_v6  ;;  %vm38_vm1 = vweird.f32 %v172_v6 }
   0xd   :  { %31 = vadd.xlane.f32.xlu0 %v30_v4  ;;  %v35_v8 = vsub.f32 1.0, %v34_v7 }
   0xf   :  { %v36_v9 = vmul.f32 %v172_v6, %v35_v8 }
  0x11   :  { %v37_v10 = vadd.f32 %v172_v6, %v36_v9 }
  0x13   :  { %v39_v11 = vsel %vm38_vm1, %v172_v6, %v37_v10 }
  0x78   :  { %v29_v12 = vpop.xlane.xlu0 %28 }
  0x79   :  { %v40_v13 = vmul.f32 %v39_v11, %v29_v12 }
  0x7b   :  { %v42_v14 = vsub.f32 %v162_v1, %v40_v13 }
  0x7d   :  { %v44_v15 = vmul.f32 %v42_v14, %v42_v14 }
  0x7f   :  { %v46_v16 = vsel %vm26_vm0, %v44_v15, 0.0 }
  0x80   :  { %47 = vadd.xlane.f32.xlu1 %v46_v16  ;;  %v32_v17 = vpop.xlane.xlu0 %31 }
  0x81   :  { %v41_v18 = vmul.f32 %v39_v11, %v32_v17 }
  0x83   :  { %v43_v19 = vsub.f32 %v163_v3, %v41_v18 }
  0x85   :  { %v45_v20 = vmul.f32 %v43_v19, %v43_v19 }
  0x87   :  { %v49_v21 = vsel %vm26_vm0, %v45_v20, 0.0 }
  0x88   :  { %50 = vadd.xlane.f32.xlu1 %v49_v21 }
  0xf3   :  { %v48_v23 = vpop.xlane.xlu1 %47 }
  0xf4   :  { %v52_v25 = vmul.f32 %v48_v23, %v39_v11 }
  0xf6   :  { %v54_v26 = vadd.f32 1e-05, %v52_v25 }
  0xf8   :  { %173 = vrsqrt.f32 %v54_v26  ;;  %vm62_vm3 = vweird.f32 %v54_v26 }
  0xfb   :  { %v51_v27 = vpop.xlane.xlu1 %50 }
  0xfc   :  { %v53_v28 = vmul.f32 %v51_v27, %v39_v11 }
  0xfe   :  { %v174_v29 = vpop.eup %173  ;;  %v55_v30 = vadd.f32 1e-05, %v53_v28 }
  0xff   :  { %v57_v31 = vmul.f32 %v174_v29, %v54_v26  ;;  %vm63_vm2 = vweird.f32 %v174_v29 }
 0x100   :  { %175 = vrsqrt.f32 %v55_v30  ;;  %vm64_vm4 = vmor %vm62_vm3, %vm63_vm2  ;;  %vm72_vm6 = vweird.f32 %v55_v30 }
 0x101   :  { %v58_v32 = vmul.f32 %v174_v29, %v57_v31 }
 0x103   :  { %v59_v33 = vmul.f32 0.5, %v58_v32 }
 0x105   :  { %v60_v34 = vsub.f32 1.5, %v59_v33 }
 0x106   :  { %v176_v35 = vpop.eup %175 }
 0x107   :  { %v61_v36 = vmul.f32 %v174_v29, %v60_v34  ;;  %v67_v37 = vmul.f32 %v176_v35, %v55_v30  ;;  %vm73_vm5 = vweird.f32 %v176_v35 }
 0x108   :  { %vm74_vm7 = vmor %vm72_vm6, %vm73_vm5 }
 0x109   :  { %v68_v38 = vmul.f32 %v176_v35, %v67_v37  ;;  %v65_v39 = vsel %vm64_vm4, %v174_v29, %v61_v36 }
 0x10a   :  { %v76_v42 = vmul.f32 %v65_v39, %v42_v14 }
 0x10b   :  { %v69_v40 = vmul.f32 0.5, %v68_v38 }
 0x10c   :  { %v82_v47 = vmul.f32 %v168_v43, %v76_v42 }
 0x10d   :  { %v70_v41 = vsub.f32 1.5, %v69_v40 }
 0x10e   :  { %v88_v50 = vadd.f32 %v169_v48, %v82_v47 }
 0x10f   :  { %v71_v44 = vmul.f32 %v176_v35, %v70_v41 }
 0x111   :  { %v75_v45 = vsel %vm74_vm7, %v176_v35, %v71_v44 }
 0x112   :  { %v77_v46 = vmul.f32 %v75_v45, %v43_v19 }
 0x114   :  { %v83_v49 = vmul.f32 %v168_v43, %v77_v46 }
 0x116   :  { %v89_v51 = vadd.f32 %v169_v48, %v83_v49 }
 0x118   :  { %v90_v52 = vpack.c.bf16 %v89_v51, %v88_v50 }
 0x11a   :  { %157 = vmatmul.msk.bf16.vlgmr.msra.gmra.mxu0 %vm26_vm0, %v90_v52 }
 0x197   :  { %v123_v54 = vpop.f32.mrf.mxu0 }
 0x198   :  { %v124_v55 = vadd.f32 %v170_v53, %v123_v54 }
 0x19a   :  { %129 = vst.msk [vmem:[#allocation2] sm:$0xff] %vm128_vm8, %v124_v55 }
 0x19f   :  { %v125_v56 = vpop.f32.mrf.mxu0 }
 0x1a0   :  { %v126_v57 = vadd.f32 %v170_v53, %v125_v56 }
 0x1a2   :  { %130 = vst.msk [vmem:[#allocation2 + $0x8] sm:$0xff] %vm128_vm8, %v126_v57 }
 0x1a3   :  { %143 = dma.vmem_to_hbm [thread:$0]  %s136_s28, 256, %s138_s2, [#allocation3], %s205_s6, %s205_s6, %s206_s7  }
 0x1a4   :  { %201 = dma.done.wait [#allocation3], 256  }
 0x1a5   :  { %202 = vsyncadd [#allocation3], 4294967040 }
 0x1a6   :  { %148 = vsyncpa [#allocation3], 1 }

</bundles_post_ra>
